<compile_context>
chip_gen: v5e
topology: v5e:2x2
jax: 0.10.0
libtpu: 0.0.40
codegen_flags: <defaults>
</compile_context>

<pallas_src>
import functools

import numpy as np

import jax
import jax.numpy as jnp
from jax.experimental import pallas as pl
from jax.experimental.pallas import tpu as pltpu

EPS = 1e-5


# ---------------------------------------------------------------------------
# Pallas LayerNorm kernel (BiasFree / WithBias, norm over the last axis)
# ---------------------------------------------------------------------------

def _ln_kernel(x_ref, w_ref, b_ref, o_ref, *, c, with_bias):
    # x_ref / o_ref: (tile_rows, L) with L = k * c  (k token rows packed per
    # 128-lane row; k == 1 for the unpacked path).  w_ref / b_ref: (1, L),
    # the per-channel params tiled k times.  Each c-wide lane segment is one
    # independent token, so all statistics stay strictly per row-segment.
    L = x_ref.shape[-1]
    k = L // c
    for j in range(k):                      # static unroll; k <= 4 for C >= 32
        sl = slice(j * c, (j + 1) * c)
        xs = x_ref[:, sl].astype(jnp.float32)          # (T, c)
        mu = jnp.mean(xs, axis=-1, keepdims=True)
        xc = xs - mu
        var = jnp.mean(xc * xc, axis=-1, keepdims=True)  # population variance
        inv = jax.lax.rsqrt(var + EPS)
        wj = w_ref[:, sl].astype(jnp.float32)
        # BiasFree: output keeps x un-centered (matches BiasFree_LayerNorm).
        y = (xc if with_bias else xs) * inv * wj
        if with_bias:
            y = y + b_ref[:, sl].astype(jnp.float32)
        o_ref[:, sl] = y.astype(o_ref.dtype)


def _choose_tile_rows(prows, lane_width, itemsize, target_bytes):
    """Pick a MiB-scale row tile that respects the (8,128)-type constraints."""
    sub = max(8, 32 // itemsize)                 # f32 -> 8, bf16 -> 16, int8 -> 32
    vmem_row = max(lane_width, 128) * itemsize   # VMEM rows pad to 128 lanes
    tile = max(sub, target_bytes // vmem_row)
    tile = max(sub, (tile // sub) * sub)
    if tile >= prows:
        return prows                              # single full-extent block
    # Keep >= ~8 grid steps when there is enough work (v7x megacore sharding +
    # pipeline overlap), but never shrink blocks below ~1024 rows.
    min_steps = 8
    if prows >= min_steps * 1024:
        cap = max(1024, ((prows // min_steps) // sub) * sub)
        tile = min(tile, cap)
    return max(sub, tile)


def pallas_layernorm(x, weight, bias=None, *, target_block_bytes=2 * 1024 * 1024):
    """LayerNorm over the last axis of x.

    bias=None  -> BiasFree_LayerNorm:  x * rsqrt(var + eps) * weight
    bias given -> WithBias_LayerNorm: (x - mu) * rsqrt(var + eps) * weight + bias
    """
    orig_shape = x.shape
    c = orig_shape[-1]
    rows = int(np.prod(orig_shape[:-1])) if len(orig_shape) > 1 else 1
    with_bias = bias is not None
    if bias is None:
        bias = jnp.zeros((c,), weight.dtype)

    # Lane-dense packing: put k = 128 // C token rows side by side on the
    # 128-lane axis so HBM blocks are full-width.
    k = 1
    if c < 128 and 128 % c == 0 and rows % (128 // c) == 0:
        k = 128 // c
    L = k * c
    prows = rows // k

    x2d = x.reshape(prows, L)                      # contiguous -> free reshape
    w_row = jnp.tile(weight.reshape(1, c), (1, k))
    b_row = jnp.tile(bias.reshape(1, c), (1, k))

    itemsize = jnp.dtype(x.dtype).itemsize
    tile_rows = _choose_tile_rows(prows, L, itemsize, target_block_bytes)
    # Ragged last block (prows % tile_rows != 0) is masked by Pallas; safe
    # because the reduction is strictly per packed row over C.
    num_blocks = pl.cdiv(prows, tile_rows)

    block_vmem = tile_rows * max(L, 128) * itemsize
    vmem_limit = int(min(100 * 1024 * 1024,
                         max(32 * 1024 * 1024, 5 * block_vmem)))

    kernel = functools.partial(_ln_kernel, c=c, with_bias=with_bias)
    out = pl.pallas_call(
        kernel,
        out_shape=jax.ShapeDtypeStruct((prows, L), x.dtype),
        grid=(num_blocks,),
        in_specs=[
            pl.BlockSpec((tile_rows, L), lambda i: (i, 0)),
            pl.BlockSpec((1, L), lambda i: (0, 0)),
            pl.BlockSpec((1, L), lambda i: (0, 0)),
        ],
        out_specs=pl.BlockSpec((tile_rows, L), lambda i: (i, 0)),
        compiler_params=pltpu.CompilerParams(
            dimension_semantics=("parallel",),
            vmem_limit_bytes=vmem_limit,
        ),
    )(x2d, w_row, b_row)

    return out.reshape(orig_shape)


# ---------------------------------------------------------------------------
# SCAB building blocks (XLA ops)
# ---------------------------------------------------------------------------

def to_3d(x):                                   # b c h w -> b (h w) c
    b, c, h, w = x.shape
    return jnp.transpose(x, (0, 2, 3, 1)).reshape(b, h * w, c)


def to_4d(x, h, w):                             # b (h w) c -> b c h w
    b, _, c = x.shape
    return jnp.transpose(x.reshape(b, h, w, c), (0, 3, 1, 2))


def layer_norm_4d(x, weight, bias=None):
    _, _, h, w = x.shape
    return to_4d(pallas_layernorm(to_3d(x), weight, bias), h, w)


def conv1x1(x, w, b=None):
    # w: (O, I)  == nn.Conv2d(I, O, 1).weight[:, :, 0, 0]
    y = jnp.einsum("bihw,oi->bohw", x, w)
    if b is not None:
        y = y + b.reshape(1, -1, 1, 1)
    return y


def dwconv3x3(x, w, b=None):
    # w: (C, 1, 3, 3), groups = C, padding = 1
    c = x.shape[1]
    y = jax.lax.conv_general_dilated(
        x, w, window_strides=(1, 1), padding=((1, 1), (1, 1)),
        dimension_numbers=("NCHW", "OIHW", "NCHW"),
        feature_group_count=c)
    if b is not None:
        y = y + b.reshape(1, -1, 1, 1)
    return y


def make_shift_weight(inp_channels, n_div=5):
    # Literal port of ShiftConv2d1.__init__ including its slicing of the
    # size-1 dim (for inp_channels >= n_div only the (0, 1) tap is set).
    g = inp_channels // n_div
    w = np.zeros((inp_channels, 1, 3, 3), dtype=np.float32)
    w[:, 0 * g:1 * g, 0, 1] = 1.0
    w[:, 1 * g:2 * g, 1, 2] = 1.0
    w[:, 2 * g:3 * g, 1, 1] = 1.0
    w[:, 3 * g:4 * g, 2, 1] = 1.0
    w[:, 4 * g:, 1, 1] = 1.0
    return jnp.asarray(w)


def shift_conv2d1(x, shift_w, w, b):
    return conv1x1(dwconv3x3(x, shift_w), w, b)


def lfe1(x, p):
    y = shift_conv2d1(x, p["lfe.shift0"], p["lfe.conv0.w"], p["lfe.conv0.b"])
    y = jax.nn.relu(y)
    y = shift_conv2d1(y, p["lfe.shift1"], p["lfe.conv1.w"], p["lfe.conv1.b"])
    return y


def cca_layer(x, p):
    mean = jnp.mean(x, axis=(2, 3), keepdims=True)          # adaptive avg pool
    var = jnp.mean((x - mean) ** 2, axis=(2, 3), keepdims=True)
    y = jnp.sqrt(var) + mean                                  # stdv_channels + avg
    y = conv1x1(y, p["ca.conv1.w"], p["ca.conv1.b"])
    y = jax.nn.relu(y)
    y = conv1x1(y, p["ca.conv2.w"], p["ca.conv2.b"])
    y = jax.nn.sigmoid(y)
    return x * y


def feed_forward(x, p):
    y = conv1x1(x, p["ffn.pw.w"])            # BSConvU pointwise (bias=False)
    y = dwconv3x3(y, p["ffn.dw.w"])          # depthwise 3x3 (bias=False in SCAB)
    x1, x2 = jnp.split(y, 2, axis=1)
    y = jax.nn.gelu(x1, approximate=False) * x2   # torch F.gelu default = exact
    return conv1x1(y, p["ffn.po.w"])         # project_out (bias=False)


def scab_forward(x, p, layernorm_type="BiasFree"):
    with_bias = layernorm_type != "BiasFree"
    shortcut = x
    xn = layer_norm_4d(x, p["norm1.w"], p["norm1.b"] if with_bias else None)
    x1 = lfe1(xn, p)
    x2 = cca_layer(x1, p)
    x1 = x1 * x2
    x1 = conv1x1(x1, p["conv.w"], p["conv.b"])
    y = x1 + shortcut
    yn = layer_norm_4d(y, p["norm2.w"], p["norm2.b"] if with_bias else None)
    return y + feed_forward(yn, p)


def init_scab_params(key, in_channels, out_channels,
                     ffn_factor=2.66, reduction=16, exp_ratio=4):
    ks = jax.random.split(key, 8)
    hidden = int(out_channels * ffn_factor)
    mid = out_channels * exp_ratio
    rc = out_channels // reduction

    def w2(k, o, i, scale=0.05):
        return scale * jax.random.normal(k, (o, i), jnp.float32)

    return {
        "norm1.w": jnp.ones((in_channels,), jnp.float32),
        "norm1.b": jnp.zeros((in_channels,), jnp.float32),
        "norm2.w": jnp.ones((out_channels,), jnp.float32),
        "norm2.b": jnp.zeros((out_channels,), jnp.float32),
        "lfe.shift0": make_shift_weight(in_channels),
        "lfe.conv0.w": w2(ks[0], mid, in_channels),
        "lfe.conv0.b": jnp.zeros((mid,), jnp.float32),
        "lfe.shift1": make_shift_weight(mid),
        "lfe.conv1.w": w2(ks[1], out_channels, mid),
        "lfe.conv1.b": jnp.zeros((out_channels,), jnp.float32),
        "ca.conv1.w": w2(ks[2], rc, out_channels),
        "ca.conv1.b": jnp.zeros((rc,), jnp.float32),
        "ca.conv2.w": w2(ks[3], out_channels, rc),
        "ca.conv2.b": jnp.zeros((out_channels,), jnp.float32),
        "conv.w": w2(ks[4], out_channels, out_channels),
        "conv.b": jnp.zeros((out_channels,), jnp.float32),
        "ffn.pw.w": w2(ks[5], hidden * 2, out_channels),
        "ffn.dw.w": 0.05 * jax.random.normal(ks[6], (hidden * 2, 1, 3, 3), jnp.float32),
        "ffn.po.w": w2(ks[7], out_channels, hidden),
    }


if __name__ == "__main__":
    key = jax.random.PRNGKey(0)
    k_x, k_p, k_t1, k_t2 = jax.random.split(key, 4)

    # --- check the Pallas LayerNorm kernel against a pure-JAX reference ---
    def ln_ref(t, w, b=None):
        mu = jnp.mean(t, axis=-1, keepdims=True)
        var = jnp.mean((t - mu) ** 2, axis=-1, keepdims=True)
        if b is None:
            return t * jax.lax.rsqrt(var + EPS) * w              # BiasFree
        return (t - mu) * jax.lax.rsqrt(var + EPS) * w + b       # WithBias

    t_packed = jax.random.normal(k_t1, (2, 256, 32), jnp.float32)   # C=32: packed path
    w32 = jnp.linspace(0.5, 1.5, 32, dtype=jnp.float32)
    b32 = jnp.linspace(-0.1, 0.1, 32, dtype=jnp.float32)
    got = pallas_layernorm(t_packed, w32)
    assert jnp.allclose(got, ln_ref(t_packed, w32), atol=1e-5, rtol=1e-5)
    got = pallas_layernorm(t_packed, w32, b32)
    assert jnp.allclose(got, ln_ref(t_packed, w32, b32), atol=1e-5, rtol=1e-5)

    t_wide = jax.random.normal(k_t2, (4, 96, 160), jnp.float32)     # C=160: unpacked path
    w160 = jnp.linspace(0.8, 1.2, 160, dtype=jnp.float32)
    got = pallas_layernorm(t_wide, w160)
    assert jnp.allclose(got, ln_ref(t_wide, w160), atol=1e-5, rtol=1e-5)

    # --- full SCAB forward (BiasFree LayerNorm, as used in BHAN) ---
    B, C, H, W = 2, 32, 16, 16
    x = jax.random.normal(k_x, (B, C, H, W), jnp.float32)
    params = init_scab_params(k_p, C, C)

    out = jax.jit(scab_forward)(x, params)
    out = jax.block_until_ready(out)
    assert out.shape == x.shape and out.dtype == x.dtype
    assert bool(jnp.all(jnp.isfinite(out)))

    print("KERNEL_OK")
</pallas_src>

<mosaic_0001>
module attributes {stable_mosaic.version = 11 : i64} {
  func.func @_ln_kernel(%arg0: i32, %arg1: memref<128x128xf32, #tpu.memory_space<vmem>>, %arg2: memref<1x128xf32, #tpu.memory_space<vmem>>, %arg3: memref<1x128xf32, #tpu.memory_space<vmem>>, %arg4: memref<128x128xf32, #tpu.memory_space<vmem>>) attributes {dimension_semantics = [#tpu.dimension_semantics<parallel>], iteration_bounds = array<i64: 1>, scalar_prefetch = 0 : i64, scratch_operands = 0 : i64, tpu.core_type = #tpu.core_type<tc>, window_params = [{transform_indices = @transform_0, window_bounds = array<i64: 128, 128>}, {pipeline_mode = #tpu.pipeline_mode<synchronous>, transform_indices = @transform_1, window_bounds = array<i64: 1, 128>}, {pipeline_mode = #tpu.pipeline_mode<synchronous>, transform_indices = @transform_2, window_bounds = array<i64: 1, 128>}, {transform_indices = @transform_3, window_bounds = array<i64: 128, 128>}]} {
    %c0 = arith.constant 0 : index
    %c0_0 = arith.constant 0 : index
    %0 = vector.load %arg1[%c0, %c0_0] : memref<128x128xf32, #tpu.memory_space<vmem>>, vector<128x32xf32>
    %cst = arith.constant dense<0.000000e+00> : vector<128xf32>
    %1 = vector.multi_reduction <add>, %0, %cst [1] : vector<128x32xf32> to vector<128xf32>
    %2 = vector.shape_cast %1 : vector<128xf32> to vector<128x1xf32>
    %cst_1 = arith.constant 3.200000e+01 : f32
    %3 = vector.broadcast %cst_1 : f32 to vector<128x1xf32>
    %4 = arith.divf %2, %3 : vector<128x1xf32>
    %5 = vector.broadcast %4 : vector<128x1xf32> to vector<128x32xf32>
    %6 = arith.subf %0, %5 : vector<128x32xf32>
    %7 = arith.mulf %6, %6 : vector<128x32xf32>
    %cst_2 = arith.constant dense<0.000000e+00> : vector<128xf32>
    %8 = vector.multi_reduction <add>, %7, %cst_2 [1] : vector<128x32xf32> to vector<128xf32>
    %9 = vector.shape_cast %8 : vector<128xf32> to vector<128x1xf32>
    %cst_3 = arith.constant 3.200000e+01 : f32
    %10 = vector.broadcast %cst_3 : f32 to vector<128x1xf32>
    %11 = arith.divf %9, %10 : vector<128x1xf32>
    %cst_4 = arith.constant 9.99999974E-6 : f32
    %12 = vector.broadcast %cst_4 : f32 to vector<128x1xf32>
    %13 = arith.addf %11, %12 : vector<128x1xf32>
    %14 = math.rsqrt %13 : vector<128x1xf32>
    %c0_5 = arith.constant 0 : index
    %c0_6 = arith.constant 0 : index
    %15 = vector.load %arg2[%c0_5, %c0_6] : memref<1x128xf32, #tpu.memory_space<vmem>>, vector<1x32xf32>
    %16 = vector.broadcast %14 : vector<128x1xf32> to vector<128x32xf32>
    %17 = arith.mulf %0, %16 : vector<128x32xf32>
    %18 = vector.broadcast %15 : vector<1x32xf32> to vector<128x32xf32>
    %19 = arith.mulf %17, %18 : vector<128x32xf32>
    %c0_7 = arith.constant 0 : index
    %c0_8 = arith.constant 0 : index
    %20 = vector.load %arg4[%c0_7, %c0_8] : memref<128x128xf32, #tpu.memory_space<vmem>>, vector<128x32xf32>
    tpu.vector_store %arg4[%c0_7, %c0_8], %19 {strides = array<i32>} : memref<128x128xf32, #tpu.memory_space<vmem>>, vector<128x32xf32>,
    %c0_9 = arith.constant 0 : index
    %c32 = arith.constant 32 : index
    %21 = vector.load %arg1[%c0_9, %c32] : memref<128x128xf32, #tpu.memory_space<vmem>>, vector<128x32xf32>
    %cst_10 = arith.constant dense<0.000000e+00> : vector<128xf32>
    %22 = vector.multi_reduction <add>, %21, %cst_10 [1] : vector<128x32xf32> to vector<128xf32>
    %23 = vector.shape_cast %22 : vector<128xf32> to vector<128x1xf32>
    %cst_11 = arith.constant 3.200000e+01 : f32
    %24 = vector.broadcast %cst_11 : f32 to vector<128x1xf32>
    %25 = arith.divf %23, %24 : vector<128x1xf32>
    %26 = vector.broadcast %25 : vector<128x1xf32> to vector<128x32xf32>
    %27 = arith.subf %21, %26 : vector<128x32xf32>
    %28 = arith.mulf %27, %27 : vector<128x32xf32>
    %cst_12 = arith.constant dense<0.000000e+00> : vector<128xf32>
    %29 = vector.multi_reduction <add>, %28, %cst_12 [1] : vector<128x32xf32> to vector<128xf32>
    %30 = vector.shape_cast %29 : vector<128xf32> to vector<128x1xf32>
    %cst_13 = arith.constant 3.200000e+01 : f32
    %31 = vector.broadcast %cst_13 : f32 to vector<128x1xf32>
    %32 = arith.divf %30, %31 : vector<128x1xf32>
    %cst_14 = arith.constant 9.99999974E-6 : f32
    %33 = vector.broadcast %cst_14 : f32 to vector<128x1xf32>
    %34 = arith.addf %32, %33 : vector<128x1xf32>
    %35 = math.rsqrt %34 : vector<128x1xf32>
    %c0_15 = arith.constant 0 : index
    %c32_16 = arith.constant 32 : index
    %36 = vector.load %arg2[%c0_15, %c32_16] : memref<1x128xf32, #tpu.memory_space<vmem>>, vector<1x32xf32>
    %37 = vector.broadcast %35 : vector<128x1xf32> to vector<128x32xf32>
    %38 = arith.mulf %21, %37 : vector<128x32xf32>
    %39 = vector.broadcast %36 : vector<1x32xf32> to vector<128x32xf32>
    %40 = arith.mulf %38, %39 : vector<128x32xf32>
    %c0_17 = arith.constant 0 : index
    %c32_18 = arith.constant 32 : index
    %41 = vector.load %arg4[%c0_17, %c32_18] : memref<128x128xf32, #tpu.memory_space<vmem>>, vector<128x32xf32>
    tpu.vector_store %arg4[%c0_17, %c32_18], %40 {strides = array<i32>} : memref<128x128xf32, #tpu.memory_space<vmem>>, vector<128x32xf32>,
    %c0_19 = arith.constant 0 : index
    %c64 = arith.constant 64 : index
    %42 = vector.load %arg1[%c0_19, %c64] : memref<128x128xf32, #tpu.memory_space<vmem>>, vector<128x32xf32>
    %cst_20 = arith.constant dense<0.000000e+00> : vector<128xf32>
    %43 = vector.multi_reduction <add>, %42, %cst_20 [1] : vector<128x32xf32> to vector<128xf32>
    %44 = vector.shape_cast %43 : vector<128xf32> to vector<128x1xf32>
    %cst_21 = arith.constant 3.200000e+01 : f32
    %45 = vector.broadcast %cst_21 : f32 to vector<128x1xf32>
    %46 = arith.divf %44, %45 : vector<128x1xf32>
    %47 = vector.broadcast %46 : vector<128x1xf32> to vector<128x32xf32>
    %48 = arith.subf %42, %47 : vector<128x32xf32>
    %49 = arith.mulf %48, %48 : vector<128x32xf32>
    %cst_22 = arith.constant dense<0.000000e+00> : vector<128xf32>
    %50 = vector.multi_reduction <add>, %49, %cst_22 [1] : vector<128x32xf32> to vector<128xf32>
    %51 = vector.shape_cast %50 : vector<128xf32> to vector<128x1xf32>
    %cst_23 = arith.constant 3.200000e+01 : f32
    %52 = vector.broadcast %cst_23 : f32 to vector<128x1xf32>
    %53 = arith.divf %51, %52 : vector<128x1xf32>
    %cst_24 = arith.constant 9.99999974E-6 : f32
    %54 = vector.broadcast %cst_24 : f32 to vector<128x1xf32>
    %55 = arith.addf %53, %54 : vector<128x1xf32>
    %56 = math.rsqrt %55 : vector<128x1xf32>
    %c0_25 = arith.constant 0 : index
    %c64_26 = arith.constant 64 : index
    %57 = vector.load %arg2[%c0_25, %c64_26] : memref<1x128xf32, #tpu.memory_space<vmem>>, vector<1x32xf32>
    %58 = vector.broadcast %56 : vector<128x1xf32> to vector<128x32xf32>
    %59 = arith.mulf %42, %58 : vector<128x32xf32>
    %60 = vector.broadcast %57 : vector<1x32xf32> to vector<128x32xf32>
    %61 = arith.mulf %59, %60 : vector<128x32xf32>
    %c0_27 = arith.constant 0 : index
    %c64_28 = arith.constant 64 : index
    %62 = vector.load %arg4[%c0_27, %c64_28] : memref<128x128xf32, #tpu.memory_space<vmem>>, vector<128x32xf32>
    tpu.vector_store %arg4[%c0_27, %c64_28], %61 {strides = array<i32>} : memref<128x128xf32, #tpu.memory_space<vmem>>, vector<128x32xf32>,
    %c0_29 = arith.constant 0 : index
    %c96 = arith.constant 96 : index
    %63 = vector.load %arg1[%c0_29, %c96] : memref<128x128xf32, #tpu.memory_space<vmem>>, vector<128x32xf32>
    %cst_30 = arith.constant dense<0.000000e+00> : vector<128xf32>
    %64 = vector.multi_reduction <add>, %63, %cst_30 [1] : vector<128x32xf32> to vector<128xf32>
    %65 = vector.shape_cast %64 : vector<128xf32> to vector<128x1xf32>
    %cst_31 = arith.constant 3.200000e+01 : f32
    %66 = vector.broadcast %cst_31 : f32 to vector<128x1xf32>
    %67 = arith.divf %65, %66 : vector<128x1xf32>
    %68 = vector.broadcast %67 : vector<128x1xf32> to vector<128x32xf32>
    %69 = arith.subf %63, %68 : vector<128x32xf32>
    %70 = arith.mulf %69, %69 : vector<128x32xf32>
    %cst_32 = arith.constant dense<0.000000e+00> : vector<128xf32>
    %71 = vector.multi_reduction <add>, %70, %cst_32 [1] : vector<128x32xf32> to vector<128xf32>
    %72 = vector.shape_cast %71 : vector<128xf32> to vector<128x1xf32>
    %cst_33 = arith.constant 3.200000e+01 : f32
    %73 = vector.broadcast %cst_33 : f32 to vector<128x1xf32>
    %74 = arith.divf %72, %73 : vector<128x1xf32>
    %cst_34 = arith.constant 9.99999974E-6 : f32
    %75 = vector.broadcast %cst_34 : f32 to vector<128x1xf32>
    %76 = arith.addf %74, %75 : vector<128x1xf32>
    %77 = math.rsqrt %76 : vector<128x1xf32>
    %c0_35 = arith.constant 0 : index
    %c96_36 = arith.constant 96 : index
    %78 = vector.load %arg2[%c0_35, %c96_36] : memref<1x128xf32, #tpu.memory_space<vmem>>, vector<1x32xf32>
    %79 = vector.broadcast %77 : vector<128x1xf32> to vector<128x32xf32>
    %80 = arith.mulf %63, %79 : vector<128x32xf32>
    %81 = vector.broadcast %78 : vector<1x32xf32> to vector<128x32xf32>
    %82 = arith.mulf %80, %81 : vector<128x32xf32>
    %c0_37 = arith.constant 0 : index
    %c96_38 = arith.constant 96 : index
    %83 = vector.load %arg4[%c0_37, %c96_38] : memref<128x128xf32, #tpu.memory_space<vmem>>, vector<128x32xf32>
    tpu.vector_store %arg4[%c0_37, %c96_38], %82 {strides = array<i32>} : memref<128x128xf32, #tpu.memory_space<vmem>>, vector<128x32xf32>,
    return
  }
  func.func @transform_0(%arg0: i32) -> (i32, i32) {
    %c0_i32 = arith.constant 0 : i32
    %c0_i32_0 = arith.constant 0 : i32
    return %arg0, %c0_i32 : i32, i32
  }
  func.func @transform_1(%arg0: i32) -> (i32, i32) {
    %c0_i32 = arith.constant 0 : i32
    %c0_i32_0 = arith.constant 0 : i32
    %c0_i32_1 = arith.constant 0 : i32
    return %c0_i32, %c0_i32_0 : i32, i32
  }
  func.func @transform_2(%arg0: i32) -> (i32, i32) {
    %c0_i32 = arith.constant 0 : i32
    %c0_i32_0 = arith.constant 0 : i32
    %c0_i32_1 = arith.constant 0 : i32
    return %c0_i32, %c0_i32_0 : i32, i32
  }
  func.func @transform_3(%arg0: i32) -> (i32, i32) {
    %c0_i32 = arith.constant 0 : i32
    %c0_i32_0 = arith.constant 0 : i32
    return %arg0, %c0_i32 : i32, i32
  }
}

</mosaic_0001>

<bundles_post_ra>
// kernel: tpu_custom_call.1
= control target key start
LH: loop header
LB: loop body
LE: loop exit
PB: predicated region body
PF: predicated region fallthrough
CT: control target
= control target key end

     0   :  { %8 = vsyncpa [#allocation3], 0  ;;  %s3670_s0 = inlined_call_operand.hbm [shape: f32[128,128], index: 0, kind: input, shape index: {}]   ;;  %s3671_s1 = inlined_call_operand.hbm [shape: f32[1,128], index: 1, kind: input, shape index: {}]   ;;  %s3672_s2 = inlined_call_operand.vmem [shape: f32[1,128], index: 2, kind: input, shape index: {}]   ;;  %s3673_s3 = inlined_call_operand.hbm [shape: f32[128,128], index: 3, kind: output, shape index: {}]  }
   0x1   :  { %9 = vsyncpa [#allocation6], 0 }
   0x2   :  { %10 = vsyncpa [#allocation4], 0  ;;  %s15_s14 = sshll.u32 %s3670_s0, 4  ;;  %s2335_s15 = smov [#allocation2]   ;;  %s16_s14 = int_to_ptr.hbm [resolvable:$true] %s15_s14 }
   0x3   :  { %s17_s16 = sshll.u32 %s2335_s15, 4  ;;  %s29_s19 = sshll.u32 %s3671_s1, 4  ;;  %s18_s16 = int_to_ptr.vmem [resolvable:$true] %s17_s16  ;;  %s30_s19 = int_to_ptr.hbm [resolvable:$true] %s29_s19 }
   0x4   :  { %s2336_s20 = smov 128   ;;  %s2337_s2 = smov 8  }
   0x5   :  { %23 = dma.hbm_to_vmem [thread:$0]  %s16_s14, 2048, %s18_s16, [#allocation3], %s2336_s20, %s2336_s20, %s2337_s2  }
   0x6   :  { %s2338_s21 = smov [#allocation5]  }
   0x7   :  { %s31_s22 = sshll.u32 %s2338_s21, 4  ;;  %s32_s22 = int_to_ptr.vmem [resolvable:$true] %s31_s22 }
   0x8   :  { %34 = dma.hbm_to_vmem [thread:$0]  %s30_s19, 16, %s32_s22, [#allocation6]  }
   0x9   :  { %2329 = dma.done.wait [#allocation3], 2048  }
   0xa   :  { %2330 = vsyncadd [#allocation3], 4294965248 }
   0xb   :  { %2331 = dma.done.wait [#allocation6], 16  }
   0xc   :  { %2332 = vsyncadd [#allocation6], 4294967280  ;;  %vm61_vm0 = vcmask 261120   ;;  %v2373_v0 = vld [vmem:[#allocation2 + $0x20] sm:$0xff]  ;;  %v2375_v1 = vld [vmem:[#allocation2 + $0x10] sm:$0xff]  ;;  %s2339_s0 = smov 96  }
   0xd   :  { %v2377_v2 = vld [vmem:[#allocation2] sm:$0xff]  ;;  %v74_v3 = vsel %vm61_vm0, %v2373_v0, 0.0  ;;  %v68_v4 = vsel %vm61_vm0, %v2375_v1, 0.0  ;;  %v2385_v6 = vld [vmem:[#allocation2 + $0x28] sm:$0xff]  ;;  %v2387_v7 = vld [vmem:[#allocation2 + $0x18] sm:$0xff]  ;;  %v2340_v32 = vmov 32.0  }
   0xe   :  { %v62_v5 = vsel %vm61_vm0, %v2377_v2, 0.0  ;;  %75 = vadd.xlane.f32.xlu2 %v74_v3  ;;  %69 = vadd.xlane.f32.xlu1 %v68_v4  ;;  %v2389_v8 = vld [vmem:[#allocation2 + $0x8] sm:$0xff]  ;;  %v77_v9 = vsel %vm61_vm0, %v2385_v6, 0.0  ;;  %v71_v10 = vsel %vm61_vm0, %v2387_v7, 0.0  ;;  %v2397_v12 = vld [vmem:[#allocation2 + $0x40] sm:$0xff]  ;;  %v2399_v13 = vld [vmem:[#allocation2 + $0x38] sm:$0xff]  ;;  %2089 = vrcp.f32 %v2340_v32 }
   0xf   :  { %63 = vadd.xlane.f32.xlu0 %v62_v5  ;;  %v65_v11 = vsel %vm61_vm0, %v2389_v8, 0.0  ;;  %v2401_v14 = vld [vmem:[#allocation2 + $0x30] sm:$0xff]  ;;  %v86_v15 = vsel %vm61_vm0, %v2397_v12, 0.0  ;;  %v83_v16 = vsel %vm61_vm0, %v2399_v13, 0.0  ;;  %v2409_v18 = vld [vmem:[#allocation2 + $0x58] sm:$0xff]  ;;  %v2413_v20 = vld [vmem:[#allocation2 + $0x48] sm:$0xff] }
  0x10   :  { %v80_v17 = vsel %vm61_vm0, %v2401_v14, 0.0  ;;  %v2411_v19 = vld [vmem:[#allocation2 + $0x50] sm:$0xff]  ;;  %v95_v21 = vsel %vm61_vm0, %v2409_v18, 0.0  ;;  %v89_v23 = vsel %vm61_vm0, %v2413_v20, 0.0  ;;  %v2423_v25 = vld [vmem:[#allocation2 + $0x68] sm:$0xff]  ;;  %v2425_v26 = vld [vmem:[#allocation2 + $0x60] sm:$0xff] }
  0x11   :  { %v92_v22 = vsel %vm61_vm0, %v2411_v19, 0.0  ;;  %v2421_v24 = vld [vmem:[#allocation2 + $0x70] sm:$0xff]  ;;  %v101_v28 = vsel %vm61_vm0, %v2423_v25, 0.0  ;;  %v98_v29 = vsel %vm61_vm0, %v2425_v26, 0.0  ;;  %v2433_v30 = vld [vmem:[#allocation2 + $0x78] sm:$0xff]  ;;  %s2341_s1 = smov 64  }
  0x12   :  { %v104_v27 = vsel %vm61_vm0, %v2421_v24, 0.0  ;;  %v107_v31 = vsel %vm61_vm0, %v2433_v30, 0.0  ;;  %s2342_s23 = smov 32   ;;  %s2343_s24 = smov [#allocation7]  }
  0x13   :  { %s2060_s25 = sshll.u32 %s2343_s24, 4  ;;  %s2062_s28 = sshll.u32 %s3673_s3, 4  ;;  %s2061_s25 = int_to_ptr.vmem [resolvable:$true] %s2060_s25  ;;  %s2063_s28 = int_to_ptr.hbm [resolvable:$true] %s2062_s28 }
  0x14   :  { %v2090_v33 = vpop.eup %2089 }
  0x15   :  { %v111_v34 = vmul.f32 32.0, %v2090_v33  ;;  %vm115_vm1 = vweird.f32 %v2090_v33 }
  0x16   :  { %78 = vadd.xlane.f32.xlu2 %v77_v9  ;;  %72 = vadd.xlane.f32.xlu1 %v71_v10 }
  0x17   :  { %66 = vadd.xlane.f32.xlu0 %v65_v11  ;;  %v112_v35 = vsub.f32 1.0, %v111_v34 }
  0x19   :  { %v113_v36 = vmul.f32 %v2090_v33, %v112_v35 }
  0x1b   :  { %v114_v37 = vadd.f32 %v2090_v33, %v113_v36 }
  0x1d   :  { %v2465_v38 = vsel %vm115_vm1, %v2090_v33, %v114_v37 }
  0x1e   :  { %87 = vadd.xlane.f32.xlu2 %v86_v15  ;;  %84 = vadd.xlane.f32.xlu1 %v83_v16 }
  0x1f   :  { %81 = vadd.xlane.f32.xlu0 %v80_v17 }
  0x26   :  { %96 = vadd.xlane.f32.xlu2 %v95_v21  ;;  %93 = vadd.xlane.f32.xlu1 %v92_v22 }
  0x27   :  { %90 = vadd.xlane.f32.xlu0 %v89_v23 }
  0x2e   :  { %105 = vadd.xlane.f32.xlu2 %v104_v27  ;;  %102 = vadd.xlane.f32.xlu1 %v101_v28 }
  0x2f   :  { %99 = vadd.xlane.f32.xlu0 %v98_v29 }
  0x37   :  { %108 = vadd.xlane.f32.xlu0 %v107_v31 }
  0x46   :  { %489 = vrot.lane.b32.xlu2 %v2377_v2, %s2339_s0 }
  0x47   :  { %493 = vrot.lane.b32.xlu1 %v2375_v1, %s2339_s0 }
  0x4b   :  { %491 = vrot.lane.b32.xlu0 %v2389_v8, %s2339_s0 }
  0x4e   :  { %495 = vrot.lane.b32.xlu2 %v2387_v7, %s2339_s0 }
  0x4f   :  { %501 = vrot.lane.b32.xlu1 %v2401_v14, %s2339_s0 }
  0x53   :  { %497 = vrot.lane.b32.xlu0 %v2373_v0, %s2339_s0 }
  0x56   :  { %499 = vrot.lane.b32.xlu2 %v2385_v6, %s2339_s0 }
  0x57   :  { %507 = vrot.lane.b32.xlu1 %v2413_v20, %s2339_s0 }
  0x5b   :  { %503 = vrot.lane.b32.xlu0 %v2399_v13, %s2339_s0 }
  0x5e   :  { %505 = vrot.lane.b32.xlu2 %v2397_v12, %s2339_s0 }
  0x5f   :  { %513 = vrot.lane.b32.xlu1 %v2425_v26, %s2339_s0 }
  0x63   :  { %509 = vrot.lane.b32.xlu0 %v2411_v19, %s2339_s0 }
  0x66   :  { %511 = vrot.lane.b32.xlu2 %v2409_v18, %s2339_s0 }
  0x6b   :  { %515 = vrot.lane.b32.xlu0 %v2423_v25, %s2339_s0 }
  0x81   :  { %v76_v39 = vpop.xlane.xlu2 %75  ;;  %v70_v40 = vpop.xlane.xlu1 %69 }
  0x82   :  { %v64_v41 = vpop.xlane.xlu0 %63  ;;  %v119_v45 = vmul.f32 %v2465_v38, %v70_v40  ;;  %v121_v54 = vmul.f32 %v2465_v38, %v76_v39 }
  0x83   :  { %v117_v42 = vmul.f32 %v2465_v38, %v64_v41 }
  0x84   :  { %v135_v53 = vsub.f32 %v2375_v1, %v119_v45  ;;  %v137_v63 = vsub.f32 %v2373_v0, %v121_v54 }
  0x85   :  { %v133_v43 = vsub.f32 %v2377_v2, %v117_v42 }
  0x86   :  { %v151_v60 = vmul.f32 %v135_v53, %v135_v53  ;;  %v153_v15 = vmul.f32 %v137_v63, %v137_v63 }
  0x87   :  { %v149_v44 = vmul.f32 %v133_v43, %v133_v43 }
  0x88   :  { %v171_v9 = vsel %vm61_vm0, %v151_v60, 0.0  ;;  %v177_v27 = vsel %vm61_vm0, %v153_v15, 0.0 }
  0x89   :  { %v79_v46 = vpop.xlane.xlu2 %78  ;;  %v73_v47 = vpop.xlane.xlu1 %72  ;;  %v165_v48 = vsel %vm61_vm0, %v149_v44, 0.0 }
  0x8a   :  { %v120_v49 = vmul.f32 %v2465_v38, %v73_v47  ;;  %166 = vadd.xlane.f32.xlu1 %v165_v48  ;;  %v67_v50 = vpop.xlane.xlu0 %66  ;;  %v122_v58 = vmul.f32 %v2465_v38, %v79_v46 }
  0x8b   :  { %v118_v51 = vmul.f32 %v2465_v38, %v67_v50 }
  0x8c   :  { %v136_v52 = vsub.f32 %v2387_v7, %v120_v49  ;;  %v138_v10 = vsub.f32 %v2385_v6, %v122_v58 }
  0x8d   :  { %v134_v55 = vsub.f32 %v2389_v8, %v118_v51 }
  0x8e   :  { %v152_v56 = vmul.f32 %v136_v52, %v136_v52  ;;  %v154_v22 = vmul.f32 %v138_v10, %v138_v10 }
  0x8f   :  { %v150_v57 = vmul.f32 %v134_v55, %v134_v55 }
  0x90   :  { %v174_v59 = vsel %vm61_vm0, %v152_v56, 0.0  ;;  %v180_v33 = vsel %vm61_vm0, %v154_v22, 0.0 }
  0x91   :  { %v85_v61 = vpop.xlane.xlu1 %84  ;;  %v168_v62 = vsel %vm61_vm0, %v150_v57, 0.0  ;;  %v88_v4 = vpop.xlane.xlu2 %87 }
  0x92   :  { %175 = vadd.xlane.f32.xlu1 %v174_v59  ;;  %169 = vadd.xlane.f32.xlu2 %v168_v62  ;;  %v82_v3 = vpop.xlane.xlu0 %81  ;;  %v124_v11 = vmul.f32 %v2465_v38, %v85_v61  ;;  %v125_v21 = vmul.f32 %v2465_v38, %v88_v4 }
  0x93   :  { %v123_v5 = vmul.f32 %v2465_v38, %v82_v3 }
  0x94   :  { %v140_v29 = vsub.f32 %v2399_v13, %v124_v11  ;;  %v141_v34 = vsub.f32 %v2397_v12, %v125_v21 }
  0x95   :  { %172 = vadd.xlane.f32.xlu0 %v171_v9  ;;  %v139_v16 = vsub.f32 %v2401_v14, %v123_v5 }
  0x96   :  { %v156_v37 = vmul.f32 %v140_v29, %v140_v29  ;;  %v157_v42 = vmul.f32 %v141_v34, %v141_v34 }
  0x97   :  { %v155_v17 = vmul.f32 %v139_v16, %v139_v16 }
  0x98   :  { %v186_v43 = vsel %vm61_vm0, %v156_v37, 0.0  ;;  %v189_v49 = vsel %vm61_vm0, %v157_v42, 0.0 }
  0x99   :  { %v94_v23 = vpop.xlane.xlu1 %93  ;;  %v183_v28 = vsel %vm61_vm0, %v155_v17, 0.0  ;;  %v97_v35 = vpop.xlane.xlu2 %96 }
  0x9a   :  { %178 = vadd.xlane.f32.xlu2 %v177_v27  ;;  %184 = vadd.xlane.f32.xlu1 %v183_v28  ;;  %v91_v31 = vpop.xlane.xlu0 %90  ;;  %v127_v36 = vmul.f32 %v2465_v38, %v94_v23  ;;  %v128_v41 = vmul.f32 %v2465_v38, %v97_v35 }
  0x9b   :  { %v126_v32 = vmul.f32 %v2465_v38, %v91_v31 }
  0x9c   :  { %v143_v45 = vsub.f32 %v2411_v19, %v127_v36  ;;  %v144_v50 = vsub.f32 %v2409_v18, %v128_v41 }
  0x9d   :  { %181 = vadd.xlane.f32.xlu0 %v180_v33  ;;  %v142_v39 = vsub.f32 %v2413_v20, %v126_v32 }
  0x9e   :  { %v159_v52 = vmul.f32 %v143_v45, %v143_v45  ;;  %v160_v57 = vmul.f32 %v144_v50, %v144_v50 }
  0x9f   :  { %v158_v40 = vmul.f32 %v142_v39, %v142_v39 }
  0xa0   :  { %v195_v58 = vsel %vm61_vm0, %v159_v52, 0.0  ;;  %v198_v63 = vsel %vm61_vm0, %v160_v57, 0.0 }
  0xa1   :  { %v192_v44 = vsel %vm61_vm0, %v158_v40, 0.0  ;;  %v103_v46 = vpop.xlane.xlu1 %102  ;;  %v106_v54 = vpop.xlane.xlu2 %105 }
  0xa2   :  { %187 = vadd.xlane.f32.xlu2 %v186_v43  ;;  %193 = vadd.xlane.f32.xlu1 %v192_v44  ;;  %v100_v47 = vpop.xlane.xlu0 %99  ;;  %v130_v51 = vmul.f32 %v2465_v38, %v103_v46  ;;  %v131_v56 = vmul.f32 %v2465_v38, %v106_v54 }
  0xa3   :  { %v129_v48 = vmul.f32 %v2465_v38, %v100_v47 }
  0xa4   :  { %v146_v60 = vsub.f32 %v2423_v25, %v130_v51  ;;  %v147_v3 = vsub.f32 %v2421_v24, %v131_v56 }
  0xa5   :  { %190 = vadd.xlane.f32.xlu0 %v189_v49  ;;  %v145_v53 = vsub.f32 %v2425_v26, %v129_v48 }
  0xa6   :  { %v162_v4 = vmul.f32 %v146_v60, %v146_v60  ;;  %v163_v10 = vmul.f32 %v147_v3, %v147_v3 }
  0xa7   :  { %v161_v55 = vmul.f32 %v145_v53, %v145_v53 }
  0xa8   :  { %v204_v11 = vsel %vm61_vm0, %v162_v4, 0.0  ;;  %v207_v16 = vsel %vm61_vm0, %v163_v10, 0.0 }
  0xa9   :  { %v201_v59 = vsel %vm61_vm0, %v161_v55, 0.0  ;;  %v490_v17 = vpop.permute.xlu2 %489 }
  0xaa   :  { %196 = vadd.xlane.f32.xlu2 %v195_v58  ;;  %202 = vadd.xlane.f32.xlu1 %v201_v59  ;;  %v109_v61 = vpop.xlane.xlu0 %108  ;;  %v537_v22 = vsel %vm61_vm0, %v490_v17, 0.0 }
  0xab   :  { %v132_v62 = vmul.f32 %v2465_v38, %v109_v61 }
  0xad   :  { %199 = vadd.xlane.f32.xlu0 %v198_v63  ;;  %v148_v5 = vsub.f32 %v2433_v30, %v132_v62 }
  0xaf   :  { %v164_v9 = vmul.f32 %v148_v5, %v148_v5 }
  0xb1   :  { %v210_v15 = vsel %vm61_vm0, %v164_v9, 0.0  ;;  %v496_v23 = vpop.permute.xlu2 %495 }
  0xb2   :  { %205 = vadd.xlane.f32.xlu2 %v204_v11  ;;  %211 = vadd.xlane.f32.xlu1 %v210_v15  ;;  %v546_v27 = vsel %vm61_vm0, %v496_v23, 0.0 }
  0xb5   :  { %208 = vadd.xlane.f32.xlu0 %v207_v16 }
  0xb9   :  { %v494_v21 = vpop.permute.xlu1 %493  ;;  %v500_v37 = vpop.permute.xlu2 %499 }
  0xba   :  { %v543_v42 = vsel %vm61_vm0, %v494_v21, 0.0  ;;  %v552_v45 = vsel %vm61_vm0, %v500_v37, 0.0 }
  0xbd   :  { %538 = vadd.xlane.f32.xlu0 %v537_v22  ;;  %v492_v33 = vpop.permute.xlu0 %491 }
  0xbe   :  { %v540_v40 = vsel %vm61_vm0, %v492_v33, 0.0 }
  0xc1   :  { %v502_v28 = vpop.permute.xlu1 %501  ;;  %v506_v41 = vpop.permute.xlu2 %505 }
  0xc2   :  { %v555_v29 = vsel %vm61_vm0, %v502_v28, 0.0  ;;  %v561_v52 = vsel %vm61_vm0, %v506_v41, 0.0 }
  0xc5   :  { %547 = vadd.xlane.f32.xlu0 %v546_v27  ;;  %v498_v36 = vpop.permute.xlu0 %497 }
  0xc6   :  { %v549_v44 = vsel %vm61_vm0, %v498_v36, 0.0 }
  0xc9   :  { %v508_v31 = vpop.permute.xlu1 %507  ;;  %v512_v46 = vpop.permute.xlu2 %511 }
  0xca   :  { %517 = vrot.lane.b32.xlu2 %v2421_v24, %s2339_s0  ;;  %v564_v32 = vsel %vm61_vm0, %v508_v31, 0.0  ;;  %v570_v5 = vsel %vm61_vm0, %v512_v46, 0.0 }
  0xcb   :  { %519 = vrot.lane.b32.xlu1 %v2433_v30, %s2339_s0 }
  0xcd   :  { %556 = vadd.xlane.f32.xlu0 %v555_v29  ;;  %v504_v39 = vpop.permute.xlu0 %503 }
  0xce   :  { %v558_v51 = vsel %vm61_vm0, %v504_v39, 0.0 }
  0xd1   :  { %v514_v34 = vpop.permute.xlu1 %513 }
  0xd2   :  { %v573_v35 = vsel %vm61_vm0, %v514_v34, 0.0  ;;  %v2554_v34 = vld [vmem:[#allocation5] ss:$0 sm:$0xff] }
  0xd5   :  { %565 = vadd.xlane.f32.xlu0 %v564_v32  ;;  %v510_v43 = vpop.permute.xlu0 %509 }
  0xd6   :  { %v567_v61 = vsel %vm61_vm0, %v510_v43, 0.0 }
  0xdd   :  { %574 = vadd.xlane.f32.xlu0 %v573_v35  ;;  %v516_v49 = vpop.permute.xlu0 %515 }
  0xde   :  { %v576_v28 = vsel %vm61_vm0, %v516_v49, 0.0 }
  0xf3   :  { %541 = vadd.xlane.f32.xlu2 %v540_v40 }
  0xf5   :  { %544 = vadd.xlane.f32.xlu1 %v543_v42 }
  0xfb   :  { %550 = vadd.xlane.f32.xlu2 %v549_v44 }
  0xfd   :  { %v167_v47 = vpop.xlane.xlu1 %166  ;;  %553 = vadd.xlane.f32.xlu1 %v552_v45 }
  0xfe   :  { %v213_v48 = vmul.f32 %v167_v47, %v2465_v38 }
 0x100   :  { %v229_v50 = vadd.f32 1e-05, %v213_v48 }
 0x102   :  { %2091 = vrsqrt.f32 %v229_v50  ;;  %vm251_vm3 = vweird.f32 %v229_v50 }
 0x103   :  { %559 = vadd.xlane.f32.xlu2 %v558_v51 }
 0x105   :  { %v176_v53 = vpop.xlane.xlu1 %175  ;;  %v170_v54 = vpop.xlane.xlu2 %169  ;;  %562 = vadd.xlane.f32.xlu1 %v561_v52 }
 0x106   :  { %v216_v55 = vmul.f32 %v176_v53, %v2465_v38  ;;  %v214_v56 = vmul.f32 %v170_v54, %v2465_v38 }
 0x108   :  { %v2092_v57 = vpop.eup %2091  ;;  %v2533_v58 = vadd.f32 1e-05, %v216_v55  ;;  %v2535_v59 = vadd.f32 1e-05, %v214_v56  ;;  %v173_v60 = vpop.xlane.xlu0 %172 }
 0x109   :  { %v246_v62 = vmul.f32 %v2092_v57, %v229_v50  ;;  %v215_v63 = vmul.f32 %v173_v60, %v2465_v38  ;;  %vm252_vm2 = vweird.f32 %v2092_v57 }
 0x10a   :  { %2093 = vrsqrt.f32 %v2533_v58  ;;  %vm253_vm4 = vmor %vm251_vm3, %vm252_vm2  ;;  %vm281_vm5 = vweird.f32 %v2533_v58  ;;  %vm261_vm6 = vweird.f32 %v2535_v59 }
 0x10b   :  { %v247_v3 = vmul.f32 %v2092_v57, %v246_v62  ;;  %2095 = vrsqrt.f32 %v2535_v59  ;;  %v2541_v4 = vadd.f32 1e-05, %v215_v63  ;;  %568 = vadd.xlane.f32.xlu2 %v567_v61 }
 0x10d   :  { %v248_v9 = vmul.f32 0.5, %v247_v3  ;;  %2097 = vrsqrt.f32 %v2541_v4  ;;  %v179_v10 = vpop.xlane.xlu2 %178  ;;  %v185_v11 = vpop.xlane.xlu1 %184  ;;  %571 = vadd.xlane.f32.xlu1 %v570_v5  ;;  %vm271_vm9 = vweird.f32 %v2541_v4 }
 0x10e   :  { %v217_v15 = vmul.f32 %v179_v10, %v2465_v38  ;;  %v219_v16 = vmul.f32 %v185_v11, %v2465_v38 }
 0x10f   :  { %v249_v17 = vsub.f32 1.5, %v248_v9 }
 0x110   :  { %v2094_v21 = vpop.eup %2093  ;;  %v2547_v22 = vadd.f32 1e-05, %v217_v15  ;;  %v2549_v23 = vadd.f32 1e-05, %v219_v16  ;;  %v182_v27 = vpop.xlane.xlu0 %181 }
 0x111   :  { %v2096_v29 = vpop.eup %2095  ;;  %v250_v31 = vmul.f32 %v2092_v57, %v249_v17  ;;  %v276_v32 = vmul.f32 %v2094_v21, %v2533_v58  ;;  %v218_v33 = vmul.f32 %v182_v27, %v2465_v38  ;;  %vm282_vm7 = vweird.f32 %v2094_v21 }
 0x112   :  { %v256_v35 = vmul.f32 %v2096_v29, %v2535_v59  ;;  %2099 = vrsqrt.f32 %v2547_v22  ;;  %vm262_vm8 = vweird.f32 %v2096_v29  ;;  %vm283_vm10 = vmor %vm281_vm5, %vm282_vm7  ;;  %vm291_vm13 = vweird.f32 %v2547_v22 }
 0x113   :  { %v2098_v36 = vpop.eup %2097  ;;  %v254_v37 = vsel %vm253_vm4, %v2092_v57, %v250_v31  ;;  %v277_v39 = vmul.f32 %v2094_v21, %v276_v32  ;;  %2101 = vrsqrt.f32 %v2549_v23  ;;  %577 = vadd.xlane.f32.xlu2 %v576_v28  ;;  %v2563_v44 = vadd.f32 1e-05, %v218_v33  ;;  %vm263_vm12 = vmor %vm261_vm6, %vm262_vm8 }
 0x114   :  { %v406_v40 = vmul.f32 %v254_v37, %v2377_v2  ;;  %v257_v41 = vmul.f32 %v2096_v29, %v256_v35  ;;  %v266_v42 = vmul.f32 %v2098_v36, %v2541_v4  ;;  %vm272_vm11 = vweird.f32 %v2098_v36 }
 0x115   :  { %v278_v43 = vmul.f32 0.5, %v277_v39  ;;  %v188_v45 = vpop.xlane.xlu2 %187  ;;  %v194_v46 = vpop.xlane.xlu1 %193  ;;  %2103 = vrsqrt.f32 %v2563_v44  ;;  %vm273_vm14 = vmor %vm271_vm9, %vm272_vm11  ;;  %vm311_vm2 = vweird.f32 %v2549_v23  ;;  %vm301_vm6 = vweird.f32 %v2563_v44 }
 0x116   :  { %v425_v47 = vmul.f32 %v2554_v34, %v406_v40  ;;  %v258_v48 = vmul.f32 0.5, %v257_v41  ;;  %v267_v49 = vmul.f32 %v2098_v36, %v266_v42  ;;  %v220_v50 = vmul.f32 %v188_v45, %v2465_v38 }
 0x117   :  { %v279_v51 = vsub.f32 1.5, %v278_v43  ;;  %v222_v52 = vmul.f32 %v194_v46, %v2465_v38 }
 0x118   :  { %v2569_v53 = vpop.eup %2099  ;;  %441 = vst.msk [vmem:[#allocation7] sm:$0xff] %vm61_vm0, %v425_v47  ;;  %v259_v54 = vsub.f32 1.5, %v258_v48  ;;  %v268_v55 = vmul.f32 0.5, %v267_v49  ;;  %v2572_v56 = vadd.f32 1e-05, %v220_v50  ;;  %v191_v57 = vpop.xlane.xlu0 %190 }
 0x119   :  { %v2574_v60 = vpop.eup %2101  ;;  %v280_v61 = vmul.f32 %v2094_v21, %v279_v51  ;;  %v286_v62 = vmul.f32 %v2569_v53, %v2547_v22  ;;  %v2579_v63 = vadd.f32 1e-05, %v222_v52  ;;  %vm292_vm15 = vweird.f32 %v2569_v53 }
 0x11a   :  { %v260_v3 = vmul.f32 %v2096_v29, %v259_v54  ;;  %v269_v5 = vsub.f32 1.5, %v268_v55  ;;  %v306_v9 = vmul.f32 %v2574_v60, %v2549_v23  ;;  %2105 = vrsqrt.f32 %v2572_v56  ;;  %vm293_vm4 = vmor %vm291_vm13, %vm292_vm15 }
 0x11b   :  { %v284_v10 = vsel %vm283_vm10, %v2094_v21, %v280_v61  ;;  %v287_v11 = vmul.f32 %v2569_v53, %v286_v62  ;;  %v2594_v27 = vpop.eup %2103  ;;  %2107 = vrsqrt.f32 %v2579_v63  ;;  %vm312_vm1 = vweird.f32 %v2574_v60 }
 0x11c   :  { %v409_v58 = vmul.f32 %v284_v10, %v2387_v7  ;;  %v264_v15 = vsel %vm263_vm12, %v2096_v29, %v260_v3  ;;  %v270_v16 = vmul.f32 %v2098_v36, %v269_v5  ;;  %v307_v17 = vmul.f32 %v2574_v60, %v306_v9  ;;  %vm313_vm5 = vmor %vm311_vm2, %vm312_vm1 }
 0x11d   :  { %v407_v21 = vmul.f32 %v264_v15, %v2389_v8  ;;  %v288_v59 = vmul.f32 0.5, %v287_v11  ;;  %v197_v28 = vpop.xlane.xlu2 %196  ;;  %v203_v31 = vpop.xlane.xlu1 %202  ;;  %v296_v35 = vmul.f32 %v2594_v27, %v2563_v44  ;;  %v221_v41 = vmul.f32 %v191_v57, %v2465_v38 }
 0x11e   :  { %v428_v32 = vmul.f32 %v2554_v34, %v409_v58  ;;  %v274_v29 = vsel %vm273_vm14, %v2098_v36, %v270_v16  ;;  %v308_v33 = vmul.f32 0.5, %v307_v17  ;;  %v223_v36 = vmul.f32 %v197_v28, %v2465_v38 }
 0x11f   :  { %v426_v37 = vmul.f32 %v2554_v34, %v407_v21  ;;  %v408_v8 = vmul.f32 %v274_v29, %v2375_v1  ;;  %v289_v4 = vsub.f32 1.5, %v288_v59  ;;  %v297_v40 = vmul.f32 %v2594_v27, %v296_v35 }
 0x120   :  { %444 = vst.msk [vmem:[#allocation7 + $0x18] sm:$0xff] %vm61_vm0, %v428_v32  ;;  %v309_v39 = vsub.f32 1.5, %v308_v33  ;;  %v200_v42 = vpop.xlane.xlu0 %199  ;;  %v2611_v43 = vpop.eup %2105  ;;  %vm302_vm3 = vweird.f32 %v2594_v27  ;;  %v225_v49 = vmul.f32 %v203_v31, %v2465_v38  ;;  %v2632_v51 = vadd.f32 1e-05, %v221_v41 }
 0x121   :  { %442 = vst.msk [vmem:[#allocation7 + $0x8] sm:$0xff] %vm61_vm0, %v426_v37  ;;  %v427_v45 = vmul.f32 %v2554_v34, %v408_v8  ;;  %v290_v1 = vmul.f32 %v2569_v53, %v289_v4  ;;  %v298_v47 = vmul.f32 0.5, %v297_v40  ;;  %v316_v48 = vmul.f32 %v2611_v43, %v2572_v56  ;;  %v2626_v50 = vpop.eup %2107  ;;  %vm303_vm7 = vmor %vm301_vm6, %vm302_vm3 }
 0x122   :  { %v310_v46 = vmul.f32 %v2574_v60, %v309_v39  ;;  %v2634_v22 = vadd.f32 1e-05, %v223_v36  ;;  %v224_v52 = vmul.f32 %v200_v42, %v2465_v38  ;;  %2109 = vrsqrt.f32 %v2632_v51 }
 0x123   :  { %443 = vst.msk [vmem:[#allocation7 + $0x10] sm:$0xff] %vm61_vm0, %v427_v45  ;;  %v294_v23 = vsel %vm293_vm4, %v2569_v53, %v290_v1  ;;  %v299_v57 = vsub.f32 1.5, %v298_v47  ;;  %v317_v61 = vmul.f32 %v2611_v43, %v316_v48  ;;  %v336_v53 = vmul.f32 %v2626_v50, %v2579_v63 }
 0x124   :  { %v410_v54 = vmul.f32 %v294_v23, %v2373_v0  ;;  %v314_v55 = vsel %vm313_vm5, %v2574_v60, %v310_v46  ;;  %vm322_vm8 = vweird.f32 %v2611_v43  ;;  %2111 = vrsqrt.f32 %v2634_v22 }
 0x125   :  { %v412_v62 = vmul.f32 %v314_v55, %v2401_v14  ;;  %v206_v3 = vpop.xlane.xlu2 %205  ;;  %v300_v9 = vmul.f32 %v2594_v27, %v299_v57  ;;  %v318_v0 = vmul.f32 0.5, %v317_v61  ;;  %v212_v10 = vpop.xlane.xlu1 %211  ;;  %v337_v11 = vmul.f32 %v2626_v50, %v336_v53 }
 0x126   :  { %v429_v5 = vmul.f32 %v2554_v34, %v410_v54  ;;  %v2655_v16 = vadd.f32 1e-05, %v225_v49  ;;  %v2657_v44 = vadd.f32 1e-05, %v224_v52  ;;  %v226_v28 = vmul.f32 %v206_v3, %v2465_v38 }
 0x127   :  { %v431_v60 = vmul.f32 %v2554_v34, %v412_v62  ;;  %v304_v58 = vsel %vm303_vm7, %v2594_v27, %v300_v9  ;;  %v319_v15 = vsub.f32 1.5, %v318_v0  ;;  %v338_v59 = vmul.f32 0.5, %v337_v11 }
 0x128   :  { %445 = vst.msk [vmem:[#allocation7 + $0x20] sm:$0xff] %vm61_vm0, %v429_v5  ;;  %v209_v17 = vpop.xlane.xlu0 %208  ;;  %v411_v21 = vmul.f32 %v304_v58, %v2385_v6  ;;  %v228_v31 = vmul.f32 %v212_v10, %v2465_v38  ;;  %vm321_vm9 = vweird.f32 %v2572_v56  ;;  %vm342_vm10 = vweird.f32 %v2626_v50  ;;  %v2667_v27 = vpop.eup %2109 }
 0x129   :  { %447 = vst.msk [vmem:[#allocation7 + $0x30] sm:$0xff] %vm61_vm0, %v431_v60  ;;  %v320_v32 = vmul.f32 %v2611_v43, %v319_v15  ;;  %2113 = vrsqrt.f32 %v2655_v16  ;;  %vm323_vm11 = vmor %vm321_vm9, %vm322_vm8  ;;  %v339_v6 = vsub.f32 1.5, %v338_v59  ;;  %v2673_v33 = vadd.f32 1e-05, %v226_v28 }
 0x12a   :  { %v430_v29 = vmul.f32 %v2554_v34, %v411_v21  ;;  %2115 = vrsqrt.f32 %v2657_v44  ;;  %v326_v56 = vmul.f32 %v2667_v27, %v2632_v51  ;;  %v2678_v37 = vadd.f32 1e-05, %v228_v31  ;;  %v2680_v8 = vpop.eup %2111 }
 0x12b   :  { %v324_v35 = vsel %vm323_vm11, %v2611_v43, %v320_v32  ;;  %v340_v39 = vmul.f32 %v2626_v50, %v339_v6  ;;  %vm341_vm12 = vweird.f32 %v2579_v63  ;;  %2117 = vrsqrt.f32 %v2673_v33 }
 0x12c   :  { %446 = vst.msk [vmem:[#allocation7 + $0x28] sm:$0xff] %vm61_vm0, %v430_v29  ;;  %v413_v4 = vmul.f32 %v324_v35, %v2399_v13  ;;  %vm343_vm13 = vmor %vm341_vm12, %vm342_vm10  ;;  %v327_v41 = vmul.f32 %v2667_v27, %v326_v56  ;;  %vm331_vm14 = vweird.f32 %v2632_v51  ;;  %v346_v36 = vmul.f32 %v2680_v8, %v2634_v22 }
 0x12d   :  { %v518_v40 = vpop.permute.xlu2 %517  ;;  %2119 = vrsqrt.f32 %v2678_v37  ;;  %v344_v42 = vsel %vm343_vm13, %v2626_v50, %v340_v39  ;;  %vm351_vm15 = vweird.f32 %v2634_v22  ;;  %v227_v63 = vmul.f32 %v209_v17, %v2465_v38 }
 0x12e   :  { %v432_v13 = vmul.f32 %v2554_v34, %v413_v4  ;;  %v415_v45 = vmul.f32 %v344_v42, %v2413_v20  ;;  %v328_v1 = vmul.f32 0.5, %v327_v41  ;;  %v347_v46 = vmul.f32 %v2680_v8, %v346_v36 }
 0x12f   :  { %v2698_v43 = vpop.eup %2113  ;;  %v579_v47 = vsel %vm61_vm0, %v518_v40, 0.0  ;;  %vm332_vm1 = vweird.f32 %v2667_v27  ;;  %vm371_vm2 = vweird.f32 %v2655_v16  ;;  %v2710_v23 = vadd.f32 1e-05, %v227_v63 }
 0x130   :  { %v539_v48 = vpop.xlane.xlu0 %538  ;;  %v2703_v49 = vpop.eup %2115  ;;  %448 = vst.msk [vmem:[#allocation7 + $0x38] sm:$0xff] %vm61_vm0, %v432_v13  ;;  %v366_v50 = vmul.f32 %v2698_v43, %v2655_v16  ;;  %580 = vadd.xlane.f32.xlu1 %v579_v47  ;;  %v434_v52 = vmul.f32 %v2554_v34, %v415_v45  ;;  %v329_v54 = vsub.f32 1.5, %v328_v1  ;;  %v348_v55 = vmul.f32 0.5, %v347_v46  ;;  %vm333_vm6 = vmor %vm331_vm14, %vm332_vm1 }
 0x131   :  { %v356_v57 = vmul.f32 %v2703_v49, %v2657_v44  ;;  %vm361_vm3 = vweird.f32 %v2657_v44  ;;  %v2716_v61 = vpop.eup %2117  ;;  %vm352_vm4 = vweird.f32 %v2680_v8  ;;  %2121 = vrsqrt.f32 %v2710_v23 }
 0x132   :  { %v367_v62 = vmul.f32 %v2698_v43, %v366_v50  ;;  %v585_v53 = vmul.f32 %v539_v48, %v2465_v38  ;;  %450 = vst.msk [vmem:[#allocation7 + $0x48] sm:$0xff] %vm61_vm0, %v434_v52  ;;  %v330_v5 = vmul.f32 %v2667_v27, %v329_v54  ;;  %v349_v9 = vsub.f32 1.5, %v348_v55  ;;  %vm353_vm9 = vmor %vm351_vm15, %vm352_vm4 }
 0x133   :  { %v2722_v3 = vpop.eup %2119  ;;  %v357_v0 = vmul.f32 %v2703_v49, %v356_v57  ;;  %v376_v10 = vmul.f32 %v2716_v61, %v2673_v33  ;;  %vm381_vm5 = vweird.f32 %v2673_v33  ;;  %vm372_vm7 = vweird.f32 %v2698_v43 }
 0x134   :  { %v368_v60 = vmul.f32 0.5, %v367_v62  ;;  %vm362_vm8 = vweird.f32 %v2703_v49  ;;  %v396_v11 = vmul.f32 %v2722_v3, %v2678_v37  ;;  %v334_v58 = vsel %vm333_vm6, %v2667_v27, %v330_v5  ;;  %vm373_vm11 = vmor %vm371_vm2, %vm372_vm7 }
 0x135   :  { %v350_v15 = vmul.f32 %v2680_v8, %v349_v9  ;;  %v358_v17 = vmul.f32 0.5, %v357_v0  ;;  %v377_v21 = vmul.f32 %v2716_v61, %v376_v10  ;;  %v414_v59 = vmul.f32 %v334_v58, %v2397_v12  ;;  %vm363_vm13 = vmor %vm361_vm3, %vm362_vm8 }
 0x136   :  { %v369_v51 = vsub.f32 1.5, %v368_v60  ;;  %v397_v28 = vmul.f32 %v2722_v3, %v396_v11  ;;  %v601_v31 = vsub.f32 %v2377_v2, %v585_v53  ;;  %vm382_vm10 = vweird.f32 %v2716_v61 }
 0x137   :  { %v354_v32 = vsel %vm353_vm9, %v2680_v8, %v350_v15  ;;  %v359_v27 = vsub.f32 1.5, %v358_v17  ;;  %v378_v29 = vmul.f32 0.5, %v377_v21  ;;  %v2122_v35 = vpop.eup %2121  ;;  %v433_v12 = vmul.f32 %v2554_v34, %v414_v59  ;;  %vm383_vm14 = vmor %vm381_vm5, %vm382_vm10  ;;  %v2812_v59 = vld [vmem:[#allocation2 + $0x8] sm:$0xff] }
 0x138   :  { %v548_v6 = vpop.xlane.xlu0 %547  ;;  %v416_v56 = vmul.f32 %v354_v32, %v2411_v19  ;;  %v370_v22 = vmul.f32 %v2698_v43, %v369_v51  ;;  %v398_v4 = vmul.f32 0.5, %v397_v28  ;;  %vm402_vm12 = vweird.f32 %v2722_v3  ;;  %v2815_v51 = vld [vmem:[#allocation2 + $0x10] sm:$0xff] }
 0x139   :  { %v360_v2 = vmul.f32 %v2703_v49, %v359_v27  ;;  %v379_v8 = vsub.f32 1.5, %v378_v29  ;;  %v386_v39 = vmul.f32 %v2122_v35, %v2710_v23  ;;  %449 = vst.msk [vmem:[#allocation7 + $0x40] sm:$0xff] %vm61_vm0, %v433_v12  ;;  %v617_v41 = vmul.f32 %v601_v31, %v601_v31 }
 0x13a   :  { %v435_v40 = vmul.f32 %v2554_v34, %v416_v56  ;;  %v374_v19 = vsel %vm373_vm11, %v2698_v43, %v370_v22  ;;  %v399_v16 = vsub.f32 1.5, %v398_v4  ;;  %vm401_vm15 = vweird.f32 %v2678_v37  ;;  %v2825_v56 = vld [vmem:[#allocation2 + $0x28] sm:$0xff] }
 0x13b   :  { %v418_v36 = vmul.f32 %v374_v19, %v2425_v26  ;;  %v364_v13 = vsel %vm363_vm13, %v2703_v49, %v360_v2  ;;  %v380_v42 = vmul.f32 %v2716_v61, %v379_v8  ;;  %v387_v63 = vmul.f32 %v2122_v35, %v386_v39  ;;  %649 = vrot.lane.b32.xlu2 %v617_v41, %s2339_s0  ;;  %vm403_vm1 = vmor %vm401_vm15, %vm402_vm12 }
 0x13c   :  { %451 = vst.msk [vmem:[#allocation7 + $0x50] sm:$0xff] %vm61_vm0, %v435_v40  ;;  %v417_v45 = vmul.f32 %v364_v13, %v2409_v18  ;;  %v400_v44 = vmul.f32 %v2722_v3, %v399_v16  ;;  %v588_v43 = vmul.f32 %v548_v6, %v2465_v38  ;;  %vm392_vm2 = vweird.f32 %v2122_v35  ;;  %v2832_v16 = vld [vmem:[#allocation2 + $0x38] sm:$0xff] }
 0x13d   :  { %v520_v1 = vpop.permute.xlu1 %519  ;;  %v437_v46 = vmul.f32 %v2554_v34, %v418_v36  ;;  %v384_v47 = vsel %vm383_vm14, %v2716_v61, %v380_v42  ;;  %v388_v18 = vmul.f32 0.5, %v387_v63  ;;  %vm391_vm3 = vweird.f32 %v2710_v23  ;;  %v2835_v36 = vld [vmem:[#allocation2 + $0x40] sm:$0xff] }
 0x13e   :  { %v582_v33 = vsel %vm61_vm0, %v520_v1, 0.0  ;;  %v436_v48 = vmul.f32 %v2554_v34, %v417_v45  ;;  %v419_v49 = vmul.f32 %v384_v47, %v2423_v25  ;;  %v404_v37 = vsel %vm403_vm1, %v2722_v3, %v400_v44  ;;  %vm393_vm4 = vmor %vm391_vm3, %vm392_vm2 }
 0x13f   :  { %v604_v50 = vsub.f32 %v2387_v7, %v588_v43  ;;  %583 = vadd.xlane.f32.xlu0 %v582_v33  ;;  %453 = vst.msk [vmem:[#allocation7 + $0x60] sm:$0xff] %vm61_vm0, %v437_v46  ;;  %v421_v52 = vmul.f32 %v404_v37, %v2433_v30  ;;  %v389_v54 = vsub.f32 1.5, %v388_v18  ;;  %v2842_v46 = vld [vmem:[#allocation2 + $0x50] sm:$0xff]  ;;  %v2845_v18 = vld [vmem:[#allocation2 + $0x58] sm:$0xff]  ;;  %vm973_vm8 = vcmask 523520  }
 0x140   :  { %v557_v55 = vpop.xlane.xlu0 %556  ;;  %452 = vst.msk [vmem:[#allocation7 + $0x58] sm:$0xff] %vm61_vm0, %v436_v48  ;;  %v438_v57 = vmul.f32 %v2554_v34, %v419_v49 }
 0x141   :  { %v620_v61 = vmul.f32 %v604_v50, %v604_v50  ;;  %v591_v62 = vmul.f32 %v557_v55, %v2465_v38  ;;  %v440_v25 = vmul.f32 %v2554_v34, %v421_v52  ;;  %v390_v53 = vmul.f32 %v2122_v35, %v389_v54  ;;  %v2851_v52 = vld [vmem:[#allocation2 + $0x68] sm:$0xff] }
 0x142   :  { %454 = vst.msk [vmem:[#allocation7 + $0x68] sm:$0xff] %vm61_vm0, %v438_v57 }
 0x143   :  { %456 = vst.msk [vmem:[#allocation7 + $0x78] sm:$0xff] %vm61_vm0, %v440_v25  ;;  %v394_v7 = vsel %vm393_vm4, %v2122_v35, %v390_v53  ;;  %655 = vrot.lane.b32.xlu2 %v620_v61, %s2339_s0  ;;  %v607_v3 = vsub.f32 %v2401_v14, %v591_v62  ;;  %v2822_v35 = vld [vmem:[#allocation2 + $0x20] sm:$0xff]  ;;  %v2856_v62 = vld [vmem:[#allocation2 + $0x70] sm:$0xff] }
 0x144   :  { %v420_v30 = vmul.f32 %v394_v7, %v2421_v24 }
 0x145   :  { %v623_v0 = vmul.f32 %v607_v3, %v607_v3 }
 0x146   :  { %v439_v5 = vmul.f32 %v2554_v34, %v420_v30 }
 0x148   :  { %v566_v9 = vpop.xlane.xlu0 %565  ;;  %455 = vst.msk [vmem:[#allocation7 + $0x70] sm:$0xff] %vm61_vm0, %v439_v5  ;;  %v2861_v5 = vld [vmem:[#allocation2 + $0x78] sm:$0xff] }
 0x149   :  { %v594_v23 = vmul.f32 %v566_v9, %v2465_v38 }
 0x14b   :  { %661 = vrot.lane.b32.xlu2 %v623_v0, %s2339_s0  ;;  %v610_v10 = vsub.f32 %v2413_v20, %v594_v23 }
 0x14d   :  { %v626_v11 = vmul.f32 %v610_v10, %v610_v10 }
 0x150   :  { %v575_v60 = vpop.xlane.xlu0 %574 }
 0x151   :  { %v597_v24 = vmul.f32 %v575_v60, %v2465_v38 }
 0x153   :  { %667 = vrot.lane.b32.xlu2 %v626_v11, %s2339_s0  ;;  %v613_v14 = vsub.f32 %v2425_v26, %v597_v24 }
 0x155   :  { %v629_v58 = vmul.f32 %v613_v14, %v613_v14 }
 0x15b   :  { %673 = vrot.lane.b32.xlu2 %v629_v58, %s2339_s0 }
 0x166   :  { %v542_v34 = vpop.xlane.xlu2 %541 }
 0x167   :  { %v586_v15 = vmul.f32 %v542_v34, %v2465_v38 }
 0x168   :  { %v545_v17 = vpop.xlane.xlu1 %544 }
 0x169   :  { %v587_v21 = vmul.f32 %v545_v17, %v2465_v38  ;;  %v602_v20 = vsub.f32 %v2812_v59, %v586_v15 }
 0x16b   :  { %v603_v28 = vsub.f32 %v2815_v51, %v587_v21  ;;  %v618_v31 = vmul.f32 %v602_v20, %v602_v20 }
 0x16d   :  { %v619_v32 = vmul.f32 %v603_v28, %v603_v28  ;;  %651 = vrot.lane.b32.xlu1 %v618_v31, %s2339_s0 }
 0x16e   :  { %v551_v26 = vpop.xlane.xlu2 %550 }
 0x16f   :  { %653 = vrot.lane.b32.xlu0 %v619_v32, %s2339_s0  ;;  %v589_v27 = vmul.f32 %v551_v26, %v2465_v38 }
 0x170   :  { %v554_v29 = vpop.xlane.xlu1 %553 }
 0x171   :  { %v590_v6 = vmul.f32 %v554_v29, %v2465_v38  ;;  %v605_v12 = vsub.f32 %v2822_v35, %v589_v27 }
 0x173   :  { %v606_v22 = vsub.f32 %v2825_v56, %v590_v6  ;;  %v621_v4 = vmul.f32 %v605_v12, %v605_v12 }
 0x175   :  { %v622_v2 = vmul.f32 %v606_v22, %v606_v22 }
 0x176   :  { %v560_v8 = vpop.xlane.xlu2 %559 }
 0x177   :  { %659 = vrot.lane.b32.xlu1 %v622_v2, %s2339_s0  ;;  %657 = vrot.lane.b32.xlu0 %v621_v4, %s2339_s0  ;;  %v592_v39 = vmul.f32 %v560_v8, %v2465_v38 }
 0x178   :  { %v563_v40 = vpop.xlane.xlu1 %562 }
 0x179   :  { %v593_v19 = vmul.f32 %v563_v40, %v2465_v38  ;;  %v608_v41 = vsub.f32 %v2832_v16, %v592_v39 }
 0x17b   :  { %v609_v13 = vsub.f32 %v2835_v36, %v593_v19  ;;  %v624_v42 = vmul.f32 %v608_v41, %v608_v41 }
 0x17d   :  { %v625_v63 = vmul.f32 %v609_v13, %v609_v13 }
 0x17e   :  { %v569_v45 = vpop.xlane.xlu2 %568 }
 0x17f   :  { %665 = vrot.lane.b32.xlu1 %v625_v63, %s2339_s0  ;;  %663 = vrot.lane.b32.xlu0 %v624_v42, %s2339_s0  ;;  %v595_v44 = vmul.f32 %v569_v45, %v2465_v38  ;;  %v2880_v42 = vld [vmem:[#allocation2] sm:$0xff] }
 0x180   :  { %v572_v43 = vpop.xlane.xlu1 %571 }
 0x181   :  { %v596_v1 = vmul.f32 %v572_v43, %v2465_v38  ;;  %v611_v47 = vsub.f32 %v2842_v46, %v595_v44  ;;  %v2885_v44 = vld [vmem:[#allocation2 + $0x18] sm:$0xff]  ;;  %v2889_v43 = vld [vmem:[#allocation2 + $0x10] sm:$0xff] }
 0x183   :  { %v612_v33 = vsub.f32 %v2845_v18, %v596_v1  ;;  %v627_v48 = vmul.f32 %v611_v47, %v611_v47  ;;  %v2893_v1 = vld [vmem:[#allocation2 + $0x30] sm:$0xff] }
 0x185   :  { %v628_v49 = vmul.f32 %v612_v33, %v612_v33 }
 0x186   :  { %v578_v37 = vpop.xlane.xlu2 %577 }
 0x187   :  { %671 = vrot.lane.b32.xlu1 %v628_v49, %s2339_s0  ;;  %669 = vrot.lane.b32.xlu0 %v627_v48, %s2339_s0  ;;  %v598_v50 = vmul.f32 %v578_v37, %v2465_v38  ;;  %v2898_v48 = vld [vmem:[#allocation2 + $0x20] sm:$0xff]  ;;  %v2902_v37 = vld [vmem:[#allocation2 + $0x48] sm:$0xff] }
 0x189   :  { %v614_v54 = vsub.f32 %v2851_v52, %v598_v50 }
 0x18b   :  { %v630_v55 = vmul.f32 %v614_v54, %v614_v54  ;;  %v2904_v54 = vld [vmem:[#allocation2 + $0x8] sm:$0xff] }
 0x18f   :  { %675 = vrot.lane.b32.xlu0 %v630_v55, %s2339_s0 }
 0x195   :  { %v650_v7 = vpop.permute.xlu2 %649 }
 0x196   :  { %v697_v10 = vsel %vm61_vm0, %v650_v7, 0.0  ;;  %v2915_v7 = vld [vmem:[#allocation2 + $0x60] sm:$0xff] }
 0x19d   :  { %v656_v0 = vpop.permute.xlu2 %655 }
 0x19e   :  { %v706_v60 = vsel %vm61_vm0, %v656_v0, 0.0  ;;  %v2917_v0 = vld [vmem:[#allocation2 + $0x28] sm:$0xff] }
 0x1a3   :  { %v581_v57 = vpop.xlane.xlu1 %580 }
 0x1a4   :  { %v599_v61 = vmul.f32 %v581_v57, %v2465_v38  ;;  %v2909_v57 = vld [vmem:[#allocation2 + $0x38] sm:$0xff] }
 0x1a5   :  { %v662_v11 = vpop.permute.xlu2 %661 }
 0x1a6   :  { %v615_v25 = vsub.f32 %v2856_v62, %v599_v61  ;;  %v715_v24 = vsel %vm61_vm0, %v662_v11, 0.0 }
 0x1a8   :  { %v631_v53 = vmul.f32 %v615_v25, %v615_v25 }
 0x1aa   :  { %677 = vrot.lane.b32.xlu1 %v631_v53, %s2339_s0 }
 0x1ad   :  { %v668_v14 = vpop.permute.xlu2 %667 }
 0x1ae   :  { %v724_v58 = vsel %vm61_vm0, %v668_v14, 0.0 }
 0x1b2   :  { %v584_v30 = vpop.xlane.xlu0 %583 }
 0x1b3   :  { %v600_v3 = vmul.f32 %v584_v30, %v2465_v38 }
 0x1b5   :  { %v616_v9 = vsub.f32 %v2861_v5, %v600_v3  ;;  %v674_v34 = vpop.permute.xlu2 %673 }
 0x1b6   :  { %v733_v15 = vsel %vm61_vm0, %v674_v34, 0.0  ;;  %v2926_v34 = vld [vmem:[#allocation5] ss:$0 sm:$0xff] }
 0x1b7   :  { %v632_v23 = vmul.f32 %v616_v9, %v616_v9 }
 0x1b9   :  { %698 = vadd.xlane.f32.xlu0 %v697_v10  ;;  %679 = vrot.lane.b32.xlu2 %v632_v23, %s2339_s0 }
 0x1c1   :  { %707 = vadd.xlane.f32.xlu0 %v706_v60  ;;  %v2922_v60 = vld [vmem:[#allocation2 + $0x50] sm:$0xff] }
 0x1c9   :  { %716 = vadd.xlane.f32.xlu0 %v715_v24 }
 0x1d1   :  { %725 = vadd.xlane.f32.xlu0 %v724_v58 }
 0x1d9   :  { %734 = vadd.xlane.f32.xlu0 %v733_v15  ;;  %v2930_v15 = vld [vmem:[#allocation2 + $0x78] sm:$0xff] }
 0x1df   :  { %v652_v17 = vpop.permute.xlu1 %651 }
 0x1e0   :  { %v700_v21 = vsel %vm61_vm0, %v652_v17, 0.0 }
 0x1e1   :  { %v654_v20 = vpop.permute.xlu0 %653  ;;  %701 = vadd.xlane.f32.xlu1 %v700_v21 }
 0x1e2   :  { %v703_v28 = vsel %vm61_vm0, %v654_v20, 0.0  ;;  %v2230_v20 = vld [vmem:[#allocation2] sm:$0xff] }
 0x1e3   :  { %704 = vadd.xlane.f32.xlu2 %v703_v28 }
 0x1e9   :  { %v660_v31 = vpop.permute.xlu1 %659  ;;  %v658_v32 = vpop.permute.xlu0 %657 }
 0x1ea   :  { %v712_v26 = vsel %vm61_vm0, %v660_v31, 0.0  ;;  %v709_v27 = vsel %vm61_vm0, %v658_v32, 0.0 }
 0x1eb   :  { %713 = vadd.xlane.f32.xlu2 %v712_v26  ;;  %710 = vadd.xlane.f32.xlu1 %v709_v27  ;;  %v2932_v26 = vld [vmem:[#allocation2 + $0x40] sm:$0xff] }
 0x1f1   :  { %v666_v29 = vpop.permute.xlu1 %665  ;;  %v664_v6 = vpop.permute.xlu0 %663 }
 0x1f2   :  { %v721_v12 = vsel %vm61_vm0, %v666_v29, 0.0  ;;  %v718_v22 = vsel %vm61_vm0, %v664_v6, 0.0 }
 0x1f3   :  { %722 = vadd.xlane.f32.xlu2 %v721_v12  ;;  %719 = vadd.xlane.f32.xlu1 %v718_v22  ;;  %v2938_v12 = vld [vmem:[#allocation2 + $0x68] sm:$0xff] }
 0x1f9   :  { %v672_v4 = vpop.permute.xlu1 %671  ;;  %v670_v2 = vpop.permute.xlu0 %669 }
 0x1fa   :  { %v730_v8 = vsel %vm61_vm0, %v672_v4, 0.0  ;;  %v727_v39 = vsel %vm61_vm0, %v670_v2, 0.0 }
 0x1fb   :  { %731 = vadd.xlane.f32.xlu2 %v730_v8  ;;  %728 = vadd.xlane.f32.xlu1 %v727_v39 }
 0x201   :  { %v676_v40 = vpop.permute.xlu0 %675 }
 0x202   :  { %v736_v19 = vsel %vm61_vm0, %v676_v40, 0.0 }
 0x203   :  { %737 = vadd.xlane.f32.xlu1 %v736_v19  ;;  %v2231_v19 = vld [vmem:[#allocation2 + $0x18] sm:$0xff] }
 0x213   :  { %v680_v41 = vpop.permute.xlu2 %679 }
 0x214   :  { %v742_v13 = vsel %vm61_vm0, %v680_v41, 0.0 }
 0x215   :  { %743 = vadd.xlane.f32.xlu0 %v742_v13 }
 0x21c   :  { %1022 = vrot.lane.b32.xlu1 %v2880_v42, %s2341_s1  ;;  %v678_v63 = vpop.permute.xlu1 %677 }
 0x21d   :  { %v739_v45 = vsel %vm61_vm0, %v678_v63, 0.0 }
 0x21e   :  { %740 = vadd.xlane.f32.xlu2 %v739_v45  ;;  %v2945_v45 = vld [vmem:[#allocation2 + $0x58] sm:$0xff] }
 0x224   :  { %1028 = vrot.lane.b32.xlu1 %v2885_v44, %s2341_s1 }
 0x229   :  { %1026 = vrot.lane.b32.xlu0 %v2889_v43, %s2341_s1 }
 0x22c   :  { %v699_v47 = vpop.xlane.xlu0 %698  ;;  %1034 = vrot.lane.b32.xlu1 %v2893_v1, %s2341_s1 }
 0x22d   :  { %v745_v33 = vmul.f32 %v699_v47, %v2465_v38 }
 0x22f   :  { %v761_v49 = vadd.f32 1e-05, %v745_v33 }
 0x231   :  { %2123 = vrsqrt.f32 %v761_v49  ;;  %1030 = vrot.lane.b32.xlu0 %v2898_v48, %s2341_s1  ;;  %vm783_vm6 = vweird.f32 %v761_v49 }
 0x234   :  { %v708_v50 = vpop.xlane.xlu0 %707  ;;  %1040 = vrot.lane.b32.xlu1 %v2902_v37, %s2341_s1 }
 0x235   :  { %v748_v55 = vmul.f32 %v708_v50, %v2465_v38 }
 0x236   :  { %1024 = vrot.lane.b32.xlu2 %v2904_v54, %s2341_s1 }
 0x237   :  { %v2124_v61 = vpop.eup %2123  ;;  %v764_v25 = vadd.f32 1e-05, %v748_v55 }
 0x238   :  { %v778_v53 = vmul.f32 %v2124_v61, %v761_v49  ;;  %vm784_vm5 = vweird.f32 %v2124_v61 }
 0x239   :  { %2125 = vrsqrt.f32 %v764_v25  ;;  %1036 = vrot.lane.b32.xlu0 %v2909_v57, %s2341_s1  ;;  %vm785_vm7 = vmor %vm783_vm6, %vm784_vm5  ;;  %vm813_vm10 = vweird.f32 %v764_v25 }
 0x23a   :  { %v779_v30 = vmul.f32 %v2124_v61, %v778_v53 }
 0x23c   :  { %v780_v3 = vmul.f32 0.5, %v779_v30  ;;  %v717_v9 = vpop.xlane.xlu0 %716  ;;  %1046 = vrot.lane.b32.xlu1 %v2915_v7, %s2341_s1 }
 0x23d   :  { %v751_v23 = vmul.f32 %v717_v9, %v2465_v38 }
 0x23e   :  { %v781_v10 = vsub.f32 1.5, %v780_v3  ;;  %1032 = vrot.lane.b32.xlu2 %v2917_v0, %s2341_s1  ;;  %v2232_v3 = vld [vmem:[#allocation2 + $0x30] sm:$0xff] }
 0x23f   :  { %v2126_v11 = vpop.eup %2125  ;;  %v767_v24 = vadd.f32 1e-05, %v751_v23 }
 0x240   :  { %v782_v14 = vmul.f32 %v2124_v61, %v781_v10  ;;  %v808_v58 = vmul.f32 %v2126_v11, %v764_v25  ;;  %vm814_vm9 = vweird.f32 %v2126_v11 }
 0x241   :  { %2127 = vrsqrt.f32 %v767_v24  ;;  %1042 = vrot.lane.b32.xlu0 %v2922_v60, %s2341_s1  ;;  %vm815_vm11 = vmor %vm813_vm10, %vm814_vm9  ;;  %vm843_vm13 = vweird.f32 %v767_v24 }
 0x242   :  { %v786_v17 = vsel %vm785_vm7, %v2124_v61, %v782_v14  ;;  %v809_v21 = vmul.f32 %v2126_v11, %v808_v58 }
 0x243   :  { %v938_v28 = vmul.f32 %v2230_v20, %v786_v17 }
 0x244   :  { %v810_v31 = vmul.f32 0.5, %v809_v21  ;;  %v726_v32 = vpop.xlane.xlu0 %725  ;;  %1052 = vrot.lane.b32.xlu1 %v2930_v15, %s2341_s1 }
 0x245   :  { %v957_v27 = vmul.f32 %v2926_v34, %v938_v28  ;;  %v754_v29 = vmul.f32 %v726_v32, %v2465_v38 }
 0x246   :  { %v811_v6 = vsub.f32 1.5, %v810_v31  ;;  %1038 = vrot.lane.b32.xlu2 %v2932_v26, %s2341_s1 }
 0x247   :  { %v2128_v22 = vpop.eup %2127  ;;  %974 = vst.msk [vmem:[#allocation7] sm:$0xff] %vm973_vm8, %v957_v27  ;;  %v770_v4 = vadd.f32 1e-05, %v754_v29 }
 0x248   :  { %v812_v2 = vmul.f32 %v2126_v11, %v811_v6  ;;  %v838_v8 = vmul.f32 %v2128_v22, %v767_v24  ;;  %vm844_vm12 = vweird.f32 %v2128_v22 }
 0x249   :  { %2129 = vrsqrt.f32 %v770_v4  ;;  %1048 = vrot.lane.b32.xlu0 %v2938_v12, %s2341_s1  ;;  %vm845_vm14 = vmor %vm843_vm13, %vm844_vm12  ;;  %vm873_vm1 = vweird.f32 %v770_v4 }
 0x24a   :  { %v816_v39 = vsel %vm815_vm11, %v2126_v11, %v812_v2  ;;  %v839_v40 = vmul.f32 %v2128_v22, %v838_v8  ;;  %v2952_v11 = vld [vmem:[#allocation2 + $0x70] sm:$0xff] }
 0x24b   :  { %v941_v41 = vmul.f32 %v2231_v19, %v816_v39 }
 0x24c   :  { %v840_v13 = vmul.f32 0.5, %v839_v40  ;;  %v735_v63 = vpop.xlane.xlu0 %734 }
 0x24d   :  { %v960_v47 = vmul.f32 %v2926_v34, %v941_v41  ;;  %v757_v33 = vmul.f32 %v735_v63, %v2465_v38 }
 0x24e   :  { %v841_v49 = vsub.f32 1.5, %v840_v13  ;;  %1044 = vrot.lane.b32.xlu2 %v2945_v45, %s2341_s1 }
 0x24f   :  { %v2130_v50 = vpop.eup %2129  ;;  %977 = vst.msk [vmem:[#allocation7 + $0x18] sm:$0xff] %vm973_vm8, %v960_v47  ;;  %v773_v55 = vadd.f32 1e-05, %v757_v33 }
 0x250   :  { %v842_v61 = vmul.f32 %v2128_v22, %v841_v49  ;;  %v868_v25 = vmul.f32 %v2130_v50, %v770_v4  ;;  %vm874_vm15 = vweird.f32 %v2130_v50 }
 0x251   :  { %2131 = vrsqrt.f32 %v773_v55  ;;  %vm875_vm2 = vmor %vm873_vm1, %vm874_vm15  ;;  %vm903_vm4 = vweird.f32 %v773_v55 }
 0x252   :  { %v846_v53 = vsel %vm845_vm14, %v2128_v22, %v842_v61  ;;  %v869_v30 = vmul.f32 %v2130_v50, %v868_v25  ;;  %v2233_v22 = vld [vmem:[#allocation2 + $0x48] sm:$0xff] }
 0x253   :  { %v944_v9 = vmul.f32 %v2232_v3, %v846_v53  ;;  %v2234_v3 = vld [vmem:[#allocation2 + $0x60] sm:$0xff] }
 0x254   :  { %v870_v23 = vmul.f32 0.5, %v869_v30  ;;  %v702_v10 = vpop.xlane.xlu1 %701 }
 0x255   :  { %v963_v14 = vmul.f32 %v2926_v34, %v944_v9  ;;  %v746_v58 = vmul.f32 %v702_v10, %v2465_v38 }
 0x256   :  { %v871_v17 = vsub.f32 1.5, %v870_v23  ;;  %v705_v21 = vpop.xlane.xlu2 %704  ;;  %1050 = vrot.lane.b32.xlu2 %v2952_v11, %s2341_s1 }
 0x257   :  { %v2132_v20 = vpop.eup %2131  ;;  %980 = vst.msk [vmem:[#allocation7 + $0x30] sm:$0xff] %vm973_vm8, %v963_v14  ;;  %v747_v24 = vmul.f32 %v705_v21, %v2465_v38  ;;  %v762_v28 = vadd.f32 1e-05, %v746_v58 }
 0x258   :  { %v872_v31 = vmul.f32 %v2130_v50, %v871_v17  ;;  %v898_v32 = vmul.f32 %v2132_v20, %v773_v55  ;;  %vm904_vm3 = vweird.f32 %v2132_v20 }
 0x259   :  { %v763_v27 = vadd.f32 1e-05, %v747_v24  ;;  %2133 = vrsqrt.f32 %v762_v28  ;;  %vm905_vm5 = vmor %vm903_vm4, %vm904_vm3  ;;  %vm793_vm6 = vweird.f32 %v762_v28 }
 0x25a   :  { %v876_v29 = vsel %vm875_vm2, %v2130_v50, %v872_v31  ;;  %v899_v6 = vmul.f32 %v2132_v20, %v898_v32 }
 0x25b   :  { %v947_v2 = vmul.f32 %v2233_v22, %v876_v29  ;;  %2135 = vrsqrt.f32 %v763_v27  ;;  %vm803_vm11 = vweird.f32 %v763_v27 }
 0x25c   :  { %v900_v8 = vmul.f32 0.5, %v899_v6 }
 0x25d   :  { %v966_v39 = vmul.f32 %v2926_v34, %v947_v2 }
 0x25e   :  { %v901_v40 = vsub.f32 1.5, %v900_v8  ;;  %v714_v19 = vpop.xlane.xlu2 %713  ;;  %v711_v41 = vpop.xlane.xlu1 %710 }
 0x25f   :  { %v2134_v13 = vpop.eup %2133  ;;  %983 = vst.msk [vmem:[#allocation7 + $0x48] sm:$0xff] %vm973_vm8, %v966_v39  ;;  %v750_v4 = vmul.f32 %v714_v19, %v2465_v38  ;;  %v749_v63 = vmul.f32 %v711_v41, %v2465_v38 }
 0x260   :  { %v902_v47 = vmul.f32 %v2132_v20, %v901_v40  ;;  %v788_v33 = vmul.f32 %v2134_v13, %v762_v28  ;;  %vm794_vm7 = vweird.f32 %v2134_v13 }
 0x261   :  { %v2136_v49 = vpop.eup %2135  ;;  %v2964_v50 = vadd.f32 1e-05, %v750_v4  ;;  %v2966_v61 = vadd.f32 1e-05, %v749_v63  ;;  %vm2972_vm9 = vmor %vm793_vm6, %vm794_vm7 }
 0x262   :  { %v906_v25 = vsel %vm905_vm5, %v2132_v20, %v902_v47  ;;  %v798_v53 = vmul.f32 %v2136_v49, %v763_v27  ;;  %v789_v30 = vmul.f32 %v2134_v13, %v788_v33  ;;  %vm804_vm10 = vweird.f32 %v2136_v49 }
 0x263   :  { %v950_v9 = vmul.f32 %v2234_v3, %v906_v25  ;;  %2137 = vrsqrt.f32 %v2964_v50  ;;  %vm805_vm12 = vmor %vm803_vm11, %vm804_vm10  ;;  %vm823_vm13 = vweird.f32 %v2966_v61  ;;  %vm833_vm1 = vweird.f32 %v2964_v50 }
 0x264   :  { %v799_v23 = vmul.f32 %v2136_v49, %v798_v53  ;;  %v790_v10 = vmul.f32 0.5, %v789_v30  ;;  %2139 = vrsqrt.f32 %v2966_v61 }
 0x265   :  { %v969_v55 = vmul.f32 %v2926_v34, %v950_v9 }
 0x266   :  { %v800_v14 = vmul.f32 0.5, %v799_v23  ;;  %v791_v58 = vsub.f32 1.5, %v790_v10  ;;  %v723_v17 = vpop.xlane.xlu2 %722  ;;  %v720_v21 = vpop.xlane.xlu1 %719 }
 0x267   :  { %986 = vst.msk [vmem:[#allocation7 + $0x60] sm:$0xff] %vm973_vm8, %v969_v55  ;;  %v753_v24 = vmul.f32 %v723_v17, %v2465_v38  ;;  %v752_v28 = vmul.f32 %v720_v21, %v2465_v38 }
 0x268   :  { %v801_v31 = vsub.f32 1.5, %v800_v14  ;;  %v792_v32 = vmul.f32 %v2134_v13, %v791_v58 }
 0x269   :  { %v2138_v29 = vpop.eup %2137  ;;  %v2978_v6 = vadd.f32 1e-05, %v753_v24  ;;  %v2980_v22 = vadd.f32 1e-05, %v752_v28 }
 0x26a   :  { %v2140_v2 = vpop.eup %2139  ;;  %v802_v8 = vmul.f32 %v2136_v49, %v801_v31  ;;  %v828_v39 = vmul.f32 %v2138_v29, %v2964_v50  ;;  %v796_v40 = vsel %vm2972_vm9, %v2134_v13, %v792_v32  ;;  %vm834_vm15 = vweird.f32 %v2138_v29 }
 0x26b   :  { %v939_v19 = vmul.f32 %v2812_v59, %v796_v40  ;;  %2141 = vrsqrt.f32 %v2978_v6  ;;  %v818_v41 = vmul.f32 %v2140_v2, %v2966_v61  ;;  %vm824_vm14 = vweird.f32 %v2140_v2  ;;  %vm835_vm3 = vmor %vm833_vm1, %vm834_vm15 }
 0x26c   :  { %v806_v4 = vsel %vm805_vm12, %v2136_v49, %v802_v8  ;;  %v829_v63 = vmul.f32 %v2138_v29, %v828_v39  ;;  %2143 = vrsqrt.f32 %v2980_v22  ;;  %vm825_vm2 = vmor %vm823_vm13, %vm824_vm14  ;;  %vm853_vm4 = vweird.f32 %v2980_v22 }
 0x26d   :  { %v940_v47 = vmul.f32 %v2815_v51, %v806_v4  ;;  %v958_v27 = vmul.f32 %v2926_v34, %v939_v19  ;;  %v819_v33 = vmul.f32 %v2140_v2, %v818_v41  ;;  %vm863_vm7 = vweird.f32 %v2978_v6 }
 0x26e   :  { %v830_v25 = vmul.f32 0.5, %v829_v63  ;;  %v732_v53 = vpop.xlane.xlu2 %731  ;;  %v729_v13 = vpop.xlane.xlu1 %728 }
 0x26f   :  { %v959_v59 = vmul.f32 %v2926_v34, %v940_v47  ;;  %975 = vst.msk [vmem:[#allocation7 + $0x8] sm:$0xff] %vm973_vm8, %v958_v27  ;;  %v756_v49 = vmul.f32 %v732_v53, %v2465_v38  ;;  %v820_v30 = vmul.f32 0.5, %v819_v33  ;;  %v755_v3 = vmul.f32 %v729_v13, %v2465_v38 }
 0x270   :  { %v831_v9 = vsub.f32 1.5, %v830_v25 }
 0x271   :  { %v2142_v51 = vpop.eup %2141  ;;  %976 = vst.msk [vmem:[#allocation7 + $0x10] sm:$0xff] %vm973_vm8, %v959_v59  ;;  %v2997_v23 = vadd.f32 1e-05, %v756_v49  ;;  %v821_v10 = vsub.f32 1.5, %v820_v30  ;;  %v771_v55 = vadd.f32 1e-05, %v755_v3 }
 0x272   :  { %v2144_v14 = vpop.eup %2143  ;;  %v832_v58 = vmul.f32 %v2138_v29, %v831_v9  ;;  %v858_v17 = vmul.f32 %v2142_v51, %v2978_v6  ;;  %vm864_vm6 = vweird.f32 %v2142_v51 }
 0x273   :  { %2145 = vrsqrt.f32 %v2997_v23  ;;  %v822_v21 = vmul.f32 %v2140_v2, %v821_v10  ;;  %v848_v20 = vmul.f32 %v2144_v14, %v2980_v22  ;;  %vm854_vm5 = vweird.f32 %v2144_v14  ;;  %vm865_vm10 = vmor %vm863_vm7, %vm864_vm6 }
 0x274   :  { %v836_v24 = vsel %vm835_vm3, %v2138_v29, %v832_v58  ;;  %v859_v28 = vmul.f32 %v2142_v51, %v858_v17  ;;  %2147 = vrsqrt.f32 %v771_v55  ;;  %vm855_vm9 = vmor %vm853_vm4, %vm854_vm5  ;;  %vm883_vm11 = vweird.f32 %v771_v55 }
 0x275   :  { %v943_v31 = vmul.f32 %v2825_v56, %v836_v24  ;;  %v826_v32 = vsel %vm825_vm2, %v2140_v2, %v822_v21  ;;  %v849_v8 = vmul.f32 %v2144_v14, %v848_v20  ;;  %vm893_vm14 = vweird.f32 %v2997_v23 }
 0x276   :  { %v860_v50 = vmul.f32 0.5, %v859_v28  ;;  %v942_v39 = vmul.f32 %v2822_v35, %v826_v32  ;;  %v738_v61 = vpop.xlane.xlu1 %737 }
 0x277   :  { %v962_v40 = vmul.f32 %v2926_v34, %v943_v31  ;;  %v850_v19 = vmul.f32 0.5, %v849_v8  ;;  %v758_v41 = vmul.f32 %v738_v61, %v2465_v38 }
 0x278   :  { %v861_v4 = vsub.f32 1.5, %v860_v50  ;;  %v961_v29 = vmul.f32 %v2926_v34, %v942_v39 }
 0x279   :  { %v2146_v63 = vpop.eup %2145  ;;  %979 = vst.msk [vmem:[#allocation7 + $0x28] sm:$0xff] %vm973_vm8, %v962_v40  ;;  %v851_v56 = vsub.f32 1.5, %v850_v19  ;;  %v774_v2 = vadd.f32 1e-05, %v758_v41 }
 0x27a   :  { %v2148_v47 = vpop.eup %2147  ;;  %v862_v35 = vmul.f32 %v2142_v51, %v861_v4  ;;  %v888_v27 = vmul.f32 %v2146_v63, %v2997_v23  ;;  %978 = vst.msk [vmem:[#allocation7 + $0x20] sm:$0xff] %vm973_vm8, %v961_v29  ;;  %vm894_vm13 = vweird.f32 %v2146_v63 }
 0x27b   :  { %v852_v33 = vmul.f32 %v2144_v14, %v851_v56  ;;  %v878_v25 = vmul.f32 %v2148_v47, %v771_v55  ;;  %2149 = vrsqrt.f32 %v774_v2  ;;  %vm884_vm12 = vweird.f32 %v2148_v47  ;;  %vm895_vm1 = vmor %vm893_vm14, %vm894_vm13 }
 0x27c   :  { %v866_v53 = vsel %vm865_vm10, %v2142_v51, %v862_v35  ;;  %v889_v13 = vmul.f32 %v2146_v63, %v888_v27  ;;  %vm885_vm15 = vmor %vm883_vm11, %vm884_vm12  ;;  %vm913_vm2 = vweird.f32 %v774_v2  ;;  %vm1506_vm14 = vcmask 785920  }
 0x27d   :  { %v946_v59 = vmul.f32 %v2835_v36, %v866_v53  ;;  %v856_v49 = vsel %vm855_vm9, %v2144_v14, %v852_v33  ;;  %v879_v30 = vmul.f32 %v2148_v47, %v878_v25 }
 0x27e   :  { %v890_v3 = vmul.f32 0.5, %v889_v13  ;;  %v945_v6 = vmul.f32 %v2832_v16, %v856_v49 }
 0x27f   :  { %v965_v9 = vmul.f32 %v2926_v34, %v946_v59  ;;  %v880_v10 = vmul.f32 0.5, %v879_v30 }
 0x280   :  { %v891_v22 = vsub.f32 1.5, %v890_v3  ;;  %v964_v58 = vmul.f32 %v2926_v34, %v945_v6 }
 0x281   :  { %v2150_v17 = vpop.eup %2149  ;;  %982 = vst.msk [vmem:[#allocation7 + $0x40] sm:$0xff] %vm973_vm8, %v965_v9  ;;  %v881_v51 = vsub.f32 1.5, %v880_v10 }
 0x282   :  { %v892_v21 = vmul.f32 %v2146_v63, %v891_v22  ;;  %981 = vst.msk [vmem:[#allocation7 + $0x38] sm:$0xff] %vm973_vm8, %v964_v58  ;;  %v908_v16 = vmul.f32 %v2150_v17, %v774_v2  ;;  %vm914_vm3 = vweird.f32 %v2150_v17 }
 0x283   :  { %v882_v36 = vmul.f32 %v2148_v47, %v881_v51  ;;  %vm915_vm4 = vmor %vm913_vm2, %vm914_vm3 }
 0x284   :  { %v896_v14 = vsel %vm895_vm1, %v2146_v63, %v892_v21  ;;  %v909_v55 = vmul.f32 %v2150_v17, %v908_v16 }
 0x285   :  { %v949_v20 = vmul.f32 %v2845_v18, %v896_v14  ;;  %v886_v24 = vsel %vm885_vm15, %v2148_v47, %v882_v36 }
 0x286   :  { %v948_v28 = vmul.f32 %v2842_v46, %v886_v24  ;;  %v910_v31 = vmul.f32 0.5, %v909_v55 }
 0x287   :  { %v968_v32 = vmul.f32 %v2926_v34, %v949_v20 }
 0x288   :  { %v967_v23 = vmul.f32 %v2926_v34, %v948_v28  ;;  %v744_v8 = vpop.xlane.xlu0 %743  ;;  %v911_v50 = vsub.f32 1.5, %v910_v31 }
 0x289   :  { %985 = vst.msk [vmem:[#allocation7 + $0x58] sm:$0xff] %vm973_vm8, %v968_v32  ;;  %v760_v39 = vmul.f32 %v744_v8, %v2465_v38 }
 0x28a   :  { %984 = vst.msk [vmem:[#allocation7 + $0x50] sm:$0xff] %vm973_vm8, %v967_v23  ;;  %v912_v18 = vmul.f32 %v2150_v17, %v911_v50 }
 0x28b   :  { %v776_v61 = vadd.f32 1e-05, %v760_v39 }
 0x28c   :  { %v916_v40 = vsel %vm915_vm4, %v2150_v17, %v912_v18 }
 0x28d   :  { %2151 = vrsqrt.f32 %v776_v61  ;;  %v951_v46 = vmul.f32 %v2851_v52, %v916_v40  ;;  %vm933_vm6 = vweird.f32 %v776_v61 }
 0x28e   :  { %v1023_v19 = vpop.permute.xlu1 %1022 }
 0x28f   :  { %v970_v41 = vmul.f32 %v2926_v34, %v951_v46  ;;  %v1070_v4 = vsel %vm61_vm0, %v1023_v19, 0.0 }
 0x290   :  { %1071 = vadd.xlane.f32.xlu0 %v1070_v4 }
 0x291   :  { %987 = vst.msk [vmem:[#allocation7 + $0x68] sm:$0xff] %vm973_vm8, %v970_v41  ;;  %v741_v29 = vpop.xlane.xlu2 %740 }
 0x292   :  { %v759_v56 = vmul.f32 %v741_v29, %v2465_v38 }
 0x293   :  { %v2152_v63 = vpop.eup %2151 }
 0x294   :  { %v928_v2 = vmul.f32 %v2152_v63, %v776_v61  ;;  %v775_v47 = vadd.f32 1e-05, %v759_v56  ;;  %vm934_vm5 = vweird.f32 %v2152_v63 }
 0x295   :  { %vm935_vm7 = vmor %vm933_vm6, %vm934_vm5 }
 0x296   :  { %v929_v35 = vmul.f32 %v2152_v63, %v928_v2  ;;  %v1029_v27 = vpop.permute.xlu1 %1028  ;;  %2153 = vrsqrt.f32 %v775_v47  ;;  %vm923_vm10 = vweird.f32 %v775_v47 }
 0x297   :  { %v1079_v33 = vsel %vm61_vm0, %v1029_v27, 0.0 }
 0x298   :  { %v930_v52 = vmul.f32 0.5, %v929_v35  ;;  %1080 = vadd.xlane.f32.xlu0 %v1079_v33 }
 0x299   :  { %v1025_v53 = vpop.permute.xlu2 %1024 }
 0x29a   :  { %v931_v25 = vsub.f32 1.5, %v930_v52  ;;  %v1073_v13 = vsel %vm61_vm0, %v1025_v53, 0.0 }
 0x29b   :  { %v1027_v59 = vpop.permute.xlu0 %1026  ;;  %1074 = vadd.xlane.f32.xlu2 %v1073_v13 }
 0x29c   :  { %v932_v49 = vmul.f32 %v2152_v63, %v931_v25  ;;  %v1076_v30 = vsel %vm61_vm0, %v1027_v59, 0.0  ;;  %v2154_v3 = vpop.eup %2153 }
 0x29d   :  { %1077 = vadd.xlane.f32.xlu1 %v1076_v30  ;;  %v918_v9 = vmul.f32 %v2154_v3, %v775_v47  ;;  %vm924_vm9 = vweird.f32 %v2154_v3 }
 0x29e   :  { %v936_v6 = vsel %vm935_vm7, %v2152_v63, %v932_v49  ;;  %v1035_v10 = vpop.permute.xlu1 %1034  ;;  %vm925_vm11 = vmor %vm923_vm10, %vm924_vm9 }
 0x29f   :  { %v953_v22 = vmul.f32 %v2861_v5, %v936_v6  ;;  %v1088_v58 = vsel %vm61_vm0, %v1035_v10, 0.0  ;;  %v919_v17 = vmul.f32 %v2154_v3, %v918_v9 }
 0x2a0   :  { %1089 = vadd.xlane.f32.xlu0 %v1088_v58 }
 0x2a1   :  { %v972_v51 = vmul.f32 %v2926_v34, %v953_v22  ;;  %v920_v21 = vmul.f32 0.5, %v919_v17  ;;  %v1033_v16 = vpop.permute.xlu2 %1032 }
 0x2a2   :  { %v1085_v14 = vsel %vm61_vm0, %v1033_v16, 0.0 }
 0x2a3   :  { %989 = vst.msk [vmem:[#allocation7 + $0x78] sm:$0xff] %vm973_vm8, %v972_v51  ;;  %v1031_v36 = vpop.permute.xlu0 %1030  ;;  %v921_v55 = vsub.f32 1.5, %v920_v21 }
 0x2a4   :  { %v1082_v20 = vsel %vm61_vm0, %v1031_v36, 0.0 }
 0x2a5   :  { %1083 = vadd.xlane.f32.xlu2 %v1082_v20  ;;  %1086 = vadd.xlane.f32.xlu1 %v1085_v14  ;;  %v922_v5 = vmul.f32 %v2154_v3, %v921_v55 }
 0x2a6   :  { %v1041_v24 = vpop.permute.xlu1 %1040 }
 0x2a7   :  { %v1097_v28 = vsel %vm61_vm0, %v1041_v24, 0.0  ;;  %v926_v31 = vsel %vm925_vm11, %v2154_v3, %v922_v5 }
 0x2a8   :  { %1098 = vadd.xlane.f32.xlu0 %v1097_v28  ;;  %v952_v32 = vmul.f32 %v2856_v62, %v926_v31 }
 0x2a9   :  { %v1039_v23 = vpop.permute.xlu2 %1038 }
 0x2aa   :  { %v971_v8 = vmul.f32 %v2926_v34, %v952_v32  ;;  %v1094_v39 = vsel %vm61_vm0, %v1039_v23, 0.0 }
 0x2ab   :  { %v1037_v50 = vpop.permute.xlu0 %1036 }
 0x2ac   :  { %v1091_v18 = vsel %vm61_vm0, %v1037_v50, 0.0  ;;  %988 = vst.msk [vmem:[#allocation7 + $0x70] sm:$0xff] %vm973_vm8, %v971_v8 }
 0x2ad   :  { %1092 = vadd.xlane.f32.xlu2 %v1091_v18  ;;  %1095 = vadd.xlane.f32.xlu1 %v1094_v39 }
 0x2ae   :  { %v1047_v61 = vpop.permute.xlu1 %1046 }
 0x2af   :  { %v1106_v40 = vsel %vm61_vm0, %v1047_v61, 0.0 }
 0x2b0   :  { %1107 = vadd.xlane.f32.xlu0 %v1106_v40 }
 0x2b1   :  { %v1045_v46 = vpop.permute.xlu2 %1044 }
 0x2b2   :  { %v1103_v62 = vsel %vm61_vm0, %v1045_v46, 0.0 }
 0x2b3   :  { %v1043_v19 = vpop.permute.xlu0 %1042 }
 0x2b4   :  { %v1100_v41 = vsel %vm61_vm0, %v1043_v19, 0.0 }
 0x2b5   :  { %1101 = vadd.xlane.f32.xlu2 %v1100_v41  ;;  %1104 = vadd.xlane.f32.xlu1 %v1103_v62 }
 0x2b6   :  { %v1053_v34 = vpop.permute.xlu1 %1052 }
 0x2b7   :  { %v1115_v4 = vsel %vm61_vm0, %v1053_v34, 0.0 }
 0x2b8   :  { %1116 = vadd.xlane.f32.xlu0 %v1115_v4 }
 0x2b9   :  { %v1051_v29 = vpop.permute.xlu2 %1050 }
 0x2ba   :  { %v1112_v56 = vsel %vm61_vm0, %v1051_v29, 0.0 }
 0x2bb   :  { %v1049_v63 = vpop.permute.xlu0 %1048 }
 0x2bc   :  { %v1109_v2 = vsel %vm61_vm0, %v1049_v63, 0.0 }
 0x2bd   :  { %1110 = vadd.xlane.f32.xlu2 %v1109_v2  ;;  %1113 = vadd.xlane.f32.xlu1 %v1112_v56 }
 0x303   :  { %v1072_v47 = vpop.xlane.xlu0 %1071 }
 0x304   :  { %v1118_v35 = vmul.f32 %v1072_v47, %v2465_v38 }
 0x306   :  { %v1134_v27 = vsub.f32 %v2880_v42, %v1118_v35 }
 0x308   :  { %v1150_v33 = vmul.f32 %v1134_v27, %v1134_v27 }
 0x30a   :  { %1182 = vrot.lane.b32.xlu2 %v1150_v33, %s2341_s1 }
 0x30b   :  { %v1081_v52 = vpop.xlane.xlu0 %1080 }
 0x30c   :  { %v1121_v25 = vmul.f32 %v1081_v52, %v2465_v38 }
 0x30e   :  { %v1137_v53 = vsub.f32 %v2885_v44, %v1121_v25  ;;  %v1075_v13 = vpop.xlane.xlu2 %1074 }
 0x30f   :  { %v1119_v59 = vmul.f32 %v1075_v13, %v2465_v38 }
 0x310   :  { %v1078_v49 = vpop.xlane.xlu1 %1077  ;;  %v1153_v30 = vmul.f32 %v1137_v53, %v1137_v53 }
 0x311   :  { %v1120_v3 = vmul.f32 %v1078_v49, %v2465_v38  ;;  %v1135_v6 = vsub.f32 %v2904_v54, %v1119_v59 }
 0x312   :  { %1188 = vrot.lane.b32.xlu2 %v1153_v30, %s2341_s1 }
 0x313   :  { %v1136_v9 = vsub.f32 %v2889_v43, %v1120_v3  ;;  %v1090_v10 = vpop.xlane.xlu0 %1089  ;;  %v1151_v22 = vmul.f32 %v1135_v6, %v1135_v6 }
 0x314   :  { %v1124_v58 = vmul.f32 %v1090_v10, %v2465_v38 }
 0x315   :  { %v1152_v17 = vmul.f32 %v1136_v9, %v1136_v9  ;;  %1184 = vrot.lane.b32.xlu1 %v1151_v22, %s2341_s1 }
 0x316   :  { %v1140_v51 = vsub.f32 %v2893_v1, %v1124_v58 }
 0x317   :  { %1186 = vrot.lane.b32.xlu0 %v1152_v17, %s2341_s1 }
 0x318   :  { %v1084_v21 = vpop.xlane.xlu2 %1083  ;;  %v1087_v16 = vpop.xlane.xlu1 %1086  ;;  %v1156_v36 = vmul.f32 %v1140_v51, %v1140_v51 }
 0x319   :  { %v1122_v14 = vmul.f32 %v1084_v21, %v2465_v38  ;;  %v1123_v55 = vmul.f32 %v1087_v16, %v2465_v38 }
 0x31a   :  { %1194 = vrot.lane.b32.xlu2 %v1156_v36, %s2341_s1 }
 0x31b   :  { %v1138_v20 = vsub.f32 %v2898_v48, %v1122_v14  ;;  %v1139_v5 = vsub.f32 %v2917_v0, %v1123_v55  ;;  %v1099_v24 = vpop.xlane.xlu0 %1098 }
 0x31c   :  { %v1127_v28 = vmul.f32 %v1099_v24, %v2465_v38 }
 0x31d   :  { %v1154_v31 = vmul.f32 %v1138_v20, %v1138_v20  ;;  %v1155_v32 = vmul.f32 %v1139_v5, %v1139_v5 }
 0x31e   :  { %v1143_v23 = vsub.f32 %v2902_v37, %v1127_v28 }
 0x31f   :  { %1190 = vrot.lane.b32.xlu0 %v1154_v31, %s2341_s1  ;;  %1192 = vrot.lane.b32.xlu1 %v1155_v32, %s2341_s1 }
 0x320   :  { %v1093_v8 = vpop.xlane.xlu2 %1092  ;;  %v1096_v50 = vpop.xlane.xlu1 %1095  ;;  %v1159_v39 = vmul.f32 %v1143_v23, %v1143_v23 }
 0x321   :  { %v1125_v18 = vmul.f32 %v1093_v8, %v2465_v38  ;;  %v1126_v61 = vmul.f32 %v1096_v50, %v2465_v38 }
 0x322   :  { %1200 = vrot.lane.b32.xlu2 %v1159_v39, %s2341_s1 }
 0x323   :  { %v1141_v40 = vsub.f32 %v2909_v57, %v1125_v18  ;;  %v1142_v46 = vsub.f32 %v2932_v26, %v1126_v61  ;;  %v1108_v19 = vpop.xlane.xlu0 %1107 }
 0x324   :  { %v1130_v62 = vmul.f32 %v1108_v19, %v2465_v38 }
 0x325   :  { %v1157_v41 = vmul.f32 %v1141_v40, %v1141_v40  ;;  %v1158_v34 = vmul.f32 %v1142_v46, %v1142_v46 }
 0x326   :  { %v1146_v4 = vsub.f32 %v2915_v7, %v1130_v62 }
 0x327   :  { %1196 = vrot.lane.b32.xlu0 %v1157_v41, %s2341_s1  ;;  %1198 = vrot.lane.b32.xlu1 %v1158_v34, %s2341_s1 }
 0x328   :  { %v1102_v29 = vpop.xlane.xlu2 %1101  ;;  %v1105_v63 = vpop.xlane.xlu1 %1104  ;;  %v1162_v56 = vmul.f32 %v1146_v4, %v1146_v4 }
 0x329   :  { %v1128_v2 = vmul.f32 %v1102_v29, %v2465_v38  ;;  %v1129_v47 = vmul.f32 %v1105_v63, %v2465_v38 }
 0x32a   :  { %1206 = vrot.lane.b32.xlu2 %v1162_v56, %s2341_s1 }
 0x32b   :  { %v1144_v35 = vsub.f32 %v2922_v60, %v1128_v2  ;;  %v1145_v27 = vsub.f32 %v2945_v45, %v1129_v47  ;;  %v1117_v33 = vpop.xlane.xlu0 %1116 }
 0x32c   :  { %v1133_v52 = vmul.f32 %v1117_v33, %v2465_v38 }
 0x32d   :  { %v1160_v25 = vmul.f32 %v1144_v35, %v1144_v35  ;;  %v1161_v53 = vmul.f32 %v1145_v27, %v1145_v27 }
 0x32e   :  { %v1149_v13 = vsub.f32 %v2930_v15, %v1133_v52  ;;  %v3157_v52 = vld [vmem:[#allocation5] ss:$0 sm:$0xff] }
 0x32f   :  { %1202 = vrot.lane.b32.xlu0 %v1160_v25, %s2341_s1  ;;  %1204 = vrot.lane.b32.xlu1 %v1161_v53, %s2341_s1  ;;  %v3159_v53 = vld [vmem:[#allocation2] sm:$0xff] }
 0x330   :  { %v1111_v59 = vpop.xlane.xlu2 %1110  ;;  %v1114_v49 = vpop.xlane.xlu1 %1113  ;;  %v1165_v30 = vmul.f32 %v1149_v13, %v1149_v13 }
 0x331   :  { %v1131_v3 = vmul.f32 %v1111_v59, %v2465_v38  ;;  %v1132_v6 = vmul.f32 %v1114_v49, %v2465_v38 }
 0x332   :  { %1212 = vrot.lane.b32.xlu2 %v1165_v30, %s2341_s1 }
 0x333   :  { %v1147_v9 = vsub.f32 %v2938_v12, %v1131_v3  ;;  %v1148_v10 = vsub.f32 %v2952_v11, %v1132_v6 }
 0x335   :  { %v1163_v22 = vmul.f32 %v1147_v9, %v1147_v9  ;;  %v1164_v58 = vmul.f32 %v1148_v10, %v1148_v10 }
 0x337   :  { %1208 = vrot.lane.b32.xlu0 %v1163_v22, %s2341_s1  ;;  %1210 = vrot.lane.b32.xlu1 %v1164_v58, %s2341_s1 }
 0x364   :  { %v1183_v17 = vpop.permute.xlu2 %1182 }
 0x365   :  { %v1230_v51 = vsel %vm61_vm0, %v1183_v17, 0.0 }
 0x366   :  { %1231 = vadd.xlane.f32.xlu0 %v1230_v51 }
 0x36c   :  { %v1189_v21 = vpop.permute.xlu2 %1188 }
 0x36d   :  { %v1239_v16 = vsel %vm61_vm0, %v1189_v21, 0.0  ;;  %v3165_v21 = vld [vmem:[#allocation2 + $0x18] sm:$0xff] }
 0x36e   :  { %1240 = vadd.xlane.f32.xlu0 %v1239_v16 }
 0x374   :  { %v1195_v36 = vpop.permute.xlu2 %1194 }
 0x375   :  { %v1248_v14 = vsel %vm61_vm0, %v1195_v36, 0.0 }
 0x376   :  { %1249 = vadd.xlane.f32.xlu0 %v1248_v14 }
 0x37c   :  { %v1201_v55 = vpop.permute.xlu2 %1200 }
 0x37d   :  { %v1257_v20 = vsel %vm61_vm0, %v1201_v55, 0.0 }
 0x37e   :  { %1258 = vadd.xlane.f32.xlu0 %v1257_v20 }
 0x384   :  { %v1207_v5 = vpop.permute.xlu2 %1206 }
 0x385   :  { %v1266_v24 = vsel %vm61_vm0, %v1207_v5, 0.0 }
 0x386   :  { %1267 = vadd.xlane.f32.xlu0 %v1266_v24 }
 0x387   :  { %v1185_v28 = vpop.permute.xlu1 %1184 }
 0x388   :  { %v1233_v31 = vsel %vm61_vm0, %v1185_v28, 0.0 }
 0x389   :  { %v1187_v32 = vpop.permute.xlu0 %1186  ;;  %1234 = vadd.xlane.f32.xlu1 %v1233_v31 }
 0x38a   :  { %v1236_v23 = vsel %vm61_vm0, %v1187_v32, 0.0 }
 0x38b   :  { %1237 = vadd.xlane.f32.xlu2 %v1236_v23 }
 0x38c   :  { %v1213_v8 = vpop.permute.xlu2 %1212 }
 0x38d   :  { %v1275_v50 = vsel %vm61_vm0, %v1213_v8, 0.0 }
 0x38e   :  { %1276 = vadd.xlane.f32.xlu0 %v1275_v50 }
 0x391   :  { %v1191_v39 = vpop.permute.xlu0 %1190  ;;  %v1193_v18 = vpop.permute.xlu1 %1192 }
 0x392   :  { %v1242_v61 = vsel %vm61_vm0, %v1191_v39, 0.0  ;;  %v1245_v40 = vsel %vm61_vm0, %v1193_v18, 0.0 }
 0x393   :  { %1243 = vadd.xlane.f32.xlu1 %v1242_v61  ;;  %1246 = vadd.xlane.f32.xlu2 %v1245_v40 }
 0x399   :  { %v1197_v46 = vpop.permute.xlu0 %1196  ;;  %v1199_v19 = vpop.permute.xlu1 %1198 }
 0x39a   :  { %v1251_v62 = vsel %vm61_vm0, %v1197_v46, 0.0  ;;  %v1254_v41 = vsel %vm61_vm0, %v1199_v19, 0.0  ;;  %v3175_v46 = vld [vmem:[#allocation2 + $0x30] sm:$0xff] }
 0x39b   :  { %1252 = vadd.xlane.f32.xlu1 %v1251_v62  ;;  %1255 = vadd.xlane.f32.xlu2 %v1254_v41 }
 0x3a1   :  { %v1203_v34 = vpop.permute.xlu0 %1202  ;;  %v1205_v4 = vpop.permute.xlu1 %1204 }
 0x3a2   :  { %v1260_v29 = vsel %vm61_vm0, %v1203_v34, 0.0  ;;  %v1263_v63 = vsel %vm61_vm0, %v1205_v4, 0.0  ;;  %1559 = vrot.lane.b32.xlu0 %v2889_v43, %s2342_s23 }
 0x3a3   :  { %1261 = vadd.xlane.f32.xlu1 %v1260_v29  ;;  %1264 = vadd.xlane.f32.xlu2 %v1263_v63 }
 0x3a9   :  { %v1209_v56 = vpop.permute.xlu0 %1208  ;;  %v1211_v2 = vpop.permute.xlu1 %1210 }
 0x3aa   :  { %v1269_v47 = vsel %vm61_vm0, %v1209_v56, 0.0  ;;  %v1272_v35 = vsel %vm61_vm0, %v1211_v2, 0.0  ;;  %1561 = vrot.lane.b32.xlu0 %v2885_v44, %s2342_s23 }
 0x3ab   :  { %1270 = vadd.xlane.f32.xlu1 %v1269_v47  ;;  %1273 = vadd.xlane.f32.xlu2 %v1272_v35 }
 0x3b2   :  { %1567 = vrot.lane.b32.xlu0 %v2893_v1, %s2342_s23 }
 0x3ba   :  { %1573 = vrot.lane.b32.xlu0 %v2902_v37, %s2342_s23 }
 0x3c2   :  { %1579 = vrot.lane.b32.xlu0 %v2915_v7, %s2342_s23 }
 0x3c3   :  { %1557 = vrot.lane.b32.xlu2 %v2904_v54, %s2342_s23 }
 0x3c4   :  { %1555 = vrot.lane.b32.xlu1 %v2880_v42, %s2342_s23 }
 0x3ca   :  { %1585 = vrot.lane.b32.xlu0 %v2930_v15, %s2342_s23 }
 0x3cb   :  { %1563 = vrot.lane.b32.xlu2 %v2898_v48, %s2342_s23 }
 0x3cc   :  { %1565 = vrot.lane.b32.xlu1 %v2917_v0, %s2342_s23 }
 0x3d3   :  { %1569 = vrot.lane.b32.xlu2 %v2909_v57, %s2342_s23 }
 0x3d4   :  { %1571 = vrot.lane.b32.xlu1 %v2932_v26, %s2342_s23 }
 0x3d9   :  { %v1232_v44 = vpop.xlane.xlu0 %1231 }
 0x3da   :  { %v1278_v43 = vmul.f32 %v1232_v44, %v2465_v38 }
 0x3db   :  { %1575 = vrot.lane.b32.xlu2 %v2922_v60, %s2342_s23 }
 0x3dc   :  { %1577 = vrot.lane.b32.xlu1 %v2945_v45, %s2342_s23  ;;  %v1294_v42 = vadd.f32 1e-05, %v1278_v43 }
 0x3de   :  { %2155 = vrsqrt.f32 %v1294_v42  ;;  %vm1316_vm8 = vweird.f32 %v1294_v42 }
 0x3e1   :  { %v1241_v1 = vpop.xlane.xlu0 %1240 }
 0x3e2   :  { %v1281_v48 = vmul.f32 %v1241_v1, %v2465_v38 }
 0x3e3   :  { %1581 = vrot.lane.b32.xlu2 %v2938_v12, %s2342_s23 }
 0x3e4   :  { %v2156_v37 = vpop.eup %2155  ;;  %1583 = vrot.lane.b32.xlu1 %v2952_v11, %s2342_s23  ;;  %v1297_v54 = vadd.f32 1e-05, %v1281_v48 }
 0x3e5   :  { %v1311_v57 = vmul.f32 %v2156_v37, %v1294_v42  ;;  %vm1317_vm12 = vweird.f32 %v2156_v37 }
 0x3e6   :  { %2157 = vrsqrt.f32 %v1297_v54  ;;  %vm1318_vm13 = vmor %vm1316_vm8, %vm1317_vm12  ;;  %vm1346_vm15 = vweird.f32 %v1297_v54 }
 0x3e7   :  { %v1312_v7 = vmul.f32 %v2156_v37, %v1311_v57  ;;  %v3189_v57 = vld [vmem:[#allocation2 + $0x48] sm:$0xff] }
 0x3e9   :  { %v1313_v0 = vmul.f32 0.5, %v1312_v7  ;;  %v1250_v60 = vpop.xlane.xlu0 %1249 }
 0x3ea   :  { %v1284_v15 = vmul.f32 %v1250_v60, %v2465_v38 }
 0x3eb   :  { %v1314_v26 = vsub.f32 1.5, %v1313_v0 }
 0x3ec   :  { %v2158_v45 = vpop.eup %2157  ;;  %v1300_v27 = vadd.f32 1e-05, %v1284_v15 }
 0x3ed   :  { %v1315_v33 = vmul.f32 %v2156_v37, %v1314_v26  ;;  %v1341_v12 = vmul.f32 %v2158_v45, %v1297_v54  ;;  %vm1347_vm1 = vweird.f32 %v2158_v45 }
 0x3ee   :  { %2159 = vrsqrt.f32 %v1300_v27  ;;  %vm1348_vm2 = vmor %vm1346_vm15, %vm1347_vm1  ;;  %vm1376_vm3 = vweird.f32 %v1300_v27 }
 0x3ef   :  { %v1319_v11 = vsel %vm1318_vm13, %v2156_v37, %v1315_v33  ;;  %v1342_v25 = vmul.f32 %v2158_v45, %v1341_v12 }
 0x3f0   :  { %v1471_v13 = vmul.f32 %v3159_v53, %v1319_v11 }
 0x3f1   :  { %v1343_v59 = vmul.f32 0.5, %v1342_v25  ;;  %v1259_v49 = vpop.xlane.xlu0 %1258 }
 0x3f2   :  { %v1490_v30 = vmul.f32 %v3157_v52, %v1471_v13  ;;  %v1287_v3 = vmul.f32 %v1259_v49, %v2465_v38 }
 0x3f3   :  { %v1344_v6 = vsub.f32 1.5, %v1343_v59 }
 0x3f4   :  { %v2160_v9 = vpop.eup %2159  ;;  %1507 = vst.msk [vmem:[#allocation7] sm:$0xff] %vm1506_vm14, %v1490_v30  ;;  %v1303_v10 = vadd.f32 1e-05, %v1287_v3 }
 0x3f5   :  { %v1345_v22 = vmul.f32 %v2158_v45, %v1344_v6  ;;  %v1371_v58 = vmul.f32 %v2160_v9, %v1300_v27  ;;  %vm1377_vm4 = vweird.f32 %v2160_v9 }
 0x3f6   :  { %2161 = vrsqrt.f32 %v1303_v10  ;;  %vm1378_vm5 = vmor %vm1376_vm3, %vm1377_vm4  ;;  %vm1406_vm6 = vweird.f32 %v1303_v10 }
 0x3f7   :  { %v1349_v17 = vsel %vm1348_vm2, %v2158_v45, %v1345_v22  ;;  %v1372_v51 = vmul.f32 %v2160_v9, %v1371_v58 }
 0x3f8   :  { %v1474_v16 = vmul.f32 %v3165_v21, %v1349_v17 }
 0x3f9   :  { %v1373_v36 = vmul.f32 0.5, %v1372_v51  ;;  %v1268_v14 = vpop.xlane.xlu0 %1267 }
 0x3fa   :  { %v1493_v55 = vmul.f32 %v3157_v52, %v1474_v16  ;;  %v1290_v20 = vmul.f32 %v1268_v14, %v2465_v38 }
 0x3fb   :  { %v1374_v5 = vsub.f32 1.5, %v1373_v36 }
 0x3fc   :  { %v2162_v24 = vpop.eup %2161  ;;  %1510 = vst.msk [vmem:[#allocation7 + $0x18] sm:$0xff] %vm1506_vm14, %v1493_v55  ;;  %v1306_v28 = vadd.f32 1e-05, %v1290_v20  ;;  %v1235_v31 = vpop.xlane.xlu1 %1234  ;;  %v3219_v55 = vld [vmem:[#allocation2 + $0x60] sm:$0xff] }
 0x3fd   :  { %v1375_v32 = vmul.f32 %v2160_v9, %v1374_v5  ;;  %v1401_v23 = vmul.f32 %v2162_v24, %v1303_v10  ;;  %v1279_v8 = vmul.f32 %v1235_v31, %v2465_v38  ;;  %vm1407_vm7 = vweird.f32 %v2162_v24 }
 0x3fe   :  { %v1238_v50 = vpop.xlane.xlu2 %1237  ;;  %2163 = vrsqrt.f32 %v1306_v28  ;;  %vm1408_vm9 = vmor %vm1406_vm6, %vm1407_vm7  ;;  %vm1436_vm10 = vweird.f32 %v1306_v28 }
 0x3ff   :  { %v1379_v39 = vsel %vm1378_vm5, %v2160_v9, %v1375_v32  ;;  %v1280_v18 = vmul.f32 %v1238_v50, %v2465_v38  ;;  %v1402_v61 = vmul.f32 %v2162_v24, %v1401_v23  ;;  %v3173_v40 = vadd.f32 1e-05, %v1279_v8 }
 0x400   :  { %v1477_v19 = vmul.f32 %v3175_v46, %v1379_v39 }
 0x401   :  { %v3178_v62 = vadd.f32 1e-05, %v1280_v18  ;;  %v1403_v41 = vmul.f32 0.5, %v1402_v61  ;;  %v1277_v34 = vpop.xlane.xlu0 %1276  ;;  %2165 = vrsqrt.f32 %v3173_v40  ;;  %vm1326_vm12 = vweird.f32 %v3173_v40  ;;  %v3242_v18 = vld [vmem:[#allocation2 + $0x8] sm:$0xff] }
 0x402   :  { %v1496_v4 = vmul.f32 %v3157_v52, %v1477_v19  ;;  %v1293_v63 = vmul.f32 %v1277_v34, %v2465_v38  ;;  %v3247_v34 = vld [vmem:[#allocation2 + $0x10] sm:$0xff] }
 0x403   :  { %2167 = vrsqrt.f32 %v3178_v62  ;;  %v1404_v29 = vsub.f32 1.5, %v1403_v41  ;;  %vm1336_vm15 = vweird.f32 %v3178_v62 }
 0x404   :  { %v2164_v56 = vpop.eup %2163  ;;  %1513 = vst.msk [vmem:[#allocation7 + $0x30] sm:$0xff] %vm1506_vm14, %v1496_v4  ;;  %v3185_v35 = vadd.f32 1e-05, %v1293_v63 }
 0x405   :  { %v1405_v2 = vmul.f32 %v2162_v24, %v1404_v29  ;;  %v1431_v47 = vmul.f32 %v2164_v56, %v1306_v28  ;;  %vm1437_vm11 = vweird.f32 %v2164_v56 }
 0x406   :  { %v1244_v44 = vpop.xlane.xlu1 %1243  ;;  %v1247_v43 = vpop.xlane.xlu2 %1246  ;;  %2169 = vrsqrt.f32 %v3185_v35  ;;  %vm3203_vm8 = vmor %vm1436_vm10, %vm1437_vm11  ;;  %vm1466_vm5 = vweird.f32 %v3185_v35 }
 0x407   :  { %v1409_v42 = vsel %vm1408_vm9, %v2162_v24, %v1405_v2  ;;  %v1282_v1 = vmul.f32 %v1244_v44, %v2465_v38  ;;  %v1283_v48 = vmul.f32 %v1247_v43, %v2465_v38  ;;  %v1432_v37 = vmul.f32 %v2164_v56, %v1431_v47  ;;  %v2166_v54 = vpop.eup %2165 }
 0x408   :  { %v1480_v7 = vmul.f32 %v3189_v57, %v1409_v42  ;;  %v1321_v60 = vmul.f32 %v2166_v54, %v3173_v40  ;;  %vm1327_vm13 = vweird.f32 %v2166_v54 }
 0x409   :  { %v2168_v0 = vpop.eup %2167  ;;  %v3194_v15 = vadd.f32 1e-05, %v1282_v1  ;;  %v3196_v26 = vadd.f32 1e-05, %v1283_v48  ;;  %v1433_v33 = vmul.f32 0.5, %v1432_v37  ;;  %vm1328_vm2 = vmor %vm1326_vm12, %vm1327_vm13 }
 0x40a   :  { %v1331_v45 = vmul.f32 %v2168_v0, %v3178_v62  ;;  %v1499_v27 = vmul.f32 %v3157_v52, %v1480_v7  ;;  %v1322_v12 = vmul.f32 %v2166_v54, %v1321_v60  ;;  %vm1337_vm1 = vweird.f32 %v2168_v0 }
 0x40b   :  { %2171 = vrsqrt.f32 %v3194_v15  ;;  %v1434_v25 = vsub.f32 1.5, %v1433_v33  ;;  %vm1366_vm3 = vweird.f32 %v3196_v26  ;;  %vm1338_vm4 = vmor %vm1336_vm15, %vm1337_vm1  ;;  %vm1356_vm11 = vweird.f32 %v3194_v15 }
 0x40c   :  { %v1332_v11 = vmul.f32 %v2168_v0, %v1331_v45  ;;  %1516 = vst.msk [vmem:[#allocation7 + $0x48] sm:$0xff] %vm1506_vm14, %v1499_v27  ;;  %2173 = vrsqrt.f32 %v3196_v26  ;;  %v1323_v13 = vmul.f32 0.5, %v1322_v12  ;;  %v3207_v49 = vpop.eup %2169 }
 0x40d   :  { %v1435_v3 = vmul.f32 %v2164_v56, %v1434_v25  ;;  %v1461_v17 = vmul.f32 %v3207_v49, %v3185_v35  ;;  %vm1467_vm6 = vweird.f32 %v3207_v49 }
 0x40e   :  { %v1333_v30 = vmul.f32 0.5, %v1332_v11  ;;  %v1253_v6 = vpop.xlane.xlu1 %1252  ;;  %v1256_v9 = vpop.xlane.xlu2 %1255  ;;  %v1324_v10 = vsub.f32 1.5, %v1323_v13  ;;  %vm3267_vm10 = vmor %vm1466_vm5, %vm1467_vm6 }
 0x40f   :  { %v1285_v22 = vmul.f32 %v1253_v6, %v2465_v38  ;;  %v1286_v58 = vmul.f32 %v1256_v9, %v2465_v38  ;;  %v1439_v16 = vsel %vm3203_vm8, %v2164_v56, %v1435_v3  ;;  %v1462_v23 = vmul.f32 %v3207_v49, %v1461_v17  ;;  %v3298_v3 = vld [vmem:[#allocation2 + $0x20] sm:$0xff]  ;;  %v3307_v17 = vld [vmem:[#allocation2 + $0x28] sm:$0xff] }
 0x410   :  { %v1334_v51 = vsub.f32 1.5, %v1333_v30  ;;  %v1325_v14 = vmul.f32 %v2166_v54, %v1324_v10  ;;  %v1483_v20 = vmul.f32 %v3219_v55, %v1439_v16 }
 0x411   :  { %v3217_v36 = vpop.eup %2171  ;;  %v3222_v5 = vadd.f32 1e-05, %v1285_v22  ;;  %v3224_v24 = vadd.f32 1e-05, %v1286_v58  ;;  %v1463_v56 = vmul.f32 0.5, %v1462_v23  ;;  %v3304_v22 = vld [vmem:[#allocation2 + $0x78] sm:$0xff] }
 0x412   :  { %v3226_v28 = vpop.eup %2173  ;;  %v1335_v31 = vmul.f32 %v2168_v0, %v1334_v51  ;;  %v1351_v32 = vmul.f32 %v3217_v36, %v3194_v15  ;;  %v1329_v8 = vsel %vm1328_vm2, %v2166_v54, %v1325_v14  ;;  %v1502_v39 = vmul.f32 %v3157_v52, %v1483_v20 }
 0x413   :  { %v1361_v50 = vmul.f32 %v3226_v28, %v3196_v26  ;;  %v1472_v61 = vmul.f32 %v3242_v18, %v1329_v8  ;;  %2175 = vrsqrt.f32 %v3222_v5  ;;  %vm1367_vm7 = vweird.f32 %v3226_v28 }
 0x414   :  { %v1339_v40 = vsel %vm1338_vm4, %v2168_v0, %v1335_v31  ;;  %v1352_v19 = vmul.f32 %v3217_v36, %v1351_v32  ;;  %v1560_v41 = vpop.permute.xlu0 %1559  ;;  %1519 = vst.msk [vmem:[#allocation7 + $0x60] sm:$0xff] %vm1506_vm14, %v1502_v39  ;;  %2177 = vrsqrt.f32 %v3224_v24  ;;  %vm1357_vm9 = vweird.f32 %v3217_v36  ;;  %vm3279_vm8 = vmor %vm1366_vm3, %vm1367_vm7 }
 0x415   :  { %v1473_v62 = vmul.f32 %v3247_v34, %v1339_v40  ;;  %v1362_v4 = vmul.f32 %v3226_v28, %v1361_v50  ;;  %v1491_v29 = vmul.f32 %v3157_v52, %v1472_v61  ;;  %v1464_v37 = vsub.f32 1.5, %v1463_v56  ;;  %vm1358_vm12 = vmor %vm1356_vm11, %vm1357_vm9 }
 0x416   :  { %v1353_v63 = vmul.f32 0.5, %v1352_v19  ;;  %v1262_v2 = vpop.xlane.xlu1 %1261  ;;  %v1265_v47 = vpop.xlane.xlu2 %1264  ;;  %v1609_v54 = vsel %vm61_vm0, %v1560_v41, 0.0  ;;  %vm1396_vm13 = vweird.f32 %v3224_v24  ;;  %vm1386_vm2 = vweird.f32 %v3222_v5 }
 0x417   :  { %v1492_v44 = vmul.f32 %v3157_v52, %v1473_v62  ;;  %v1363_v43 = vmul.f32 0.5, %v1362_v4  ;;  %v1288_v42 = vmul.f32 %v1262_v2, %v2465_v38  ;;  %v1289_v1 = vmul.f32 %v1265_v47, %v2465_v38  ;;  %1508 = vst.msk [vmem:[#allocation7 + $0x8] sm:$0xff] %vm1506_vm14, %v1491_v29  ;;  %1610 = vadd.xlane.f32.xlu0 %v1609_v54 }
 0x418   :  { %v1354_v48 = vsub.f32 1.5, %v1353_v63  ;;  %v1465_v35 = vmul.f32 %v3207_v49, %v1464_v37 }
 0x419   :  { %1509 = vst.msk [vmem:[#allocation7 + $0x10] sm:$0xff] %vm1506_vm14, %v1492_v44  ;;  %v1364_v7 = vsub.f32 1.5, %v1363_v43  ;;  %v3271_v60 = vadd.f32 1e-05, %v1288_v42  ;;  %v2176_v45 = vpop.eup %2175  ;;  %v3284_v12 = vadd.f32 1e-05, %v1289_v1 }
 0x41a   :  { %v1355_v27 = vmul.f32 %v3217_v36, %v1354_v48  ;;  %v2178_v11 = vpop.eup %2177  ;;  %v1381_v15 = vmul.f32 %v2176_v45, %v3222_v5  ;;  %v1469_v59 = vsel %vm3267_vm10, %v3207_v49, %v1465_v35  ;;  %vm1387_vm1 = vweird.f32 %v2176_v45  ;;  %v3341_v48 = vld [vmem:[#allocation2 + $0x40] sm:$0xff] }
 0x41b   :  { %v1365_v25 = vmul.f32 %v3226_v28, %v1364_v7  ;;  %2179 = vrsqrt.f32 %v3271_v60  ;;  %v1391_v13 = vmul.f32 %v2178_v11, %v3224_v24  ;;  %v1486_v58 = vmul.f32 %v3304_v22, %v1469_v59  ;;  %vm1388_vm4 = vmor %vm1386_vm2, %vm1387_vm1  ;;  %v3336_v24 = vld [vmem:[#allocation2 + $0x38] sm:$0xff] }
 0x41c   :  { %v1359_v26 = vsel %vm1358_vm12, %v3217_v36, %v1355_v27  ;;  %v3296_v30 = vpop.permute.xlu0 %1561  ;;  %v1382_v10 = vmul.f32 %v2176_v45, %v1381_v15  ;;  %2181 = vrsqrt.f32 %v3284_v12  ;;  %vm1397_vm15 = vweird.f32 %v2178_v11 }
 0x41d   :  { %v1475_v6 = vmul.f32 %v3298_v3, %v1359_v26  ;;  %v1369_v9 = vsel %vm3279_vm8, %v3226_v28, %v1365_v25  ;;  %v1392_v49 = vmul.f32 %v2178_v11, %v1391_v13  ;;  %v1505_v28 = vmul.f32 %v3157_v52, %v1486_v58  ;;  %vm3326_vm3 = vmor %vm1396_vm13, %vm1397_vm15 }
 0x41e   :  { %v1476_v51 = vmul.f32 %v3307_v17, %v1369_v9  ;;  %v1271_v16 = vpop.xlane.xlu1 %1270  ;;  %v1274_v36 = vpop.xlane.xlu2 %1273  ;;  %v1383_v20 = vmul.f32 0.5, %v1382_v10  ;;  %vm1426_vm6 = vweird.f32 %v3284_v12  ;;  %vm1416_vm9 = vweird.f32 %v3271_v60 }
 0x41f   :  { %v1494_v14 = vmul.f32 %v3157_v52, %v1475_v6  ;;  %v1393_v32 = vmul.f32 0.5, %v1392_v49  ;;  %v1291_v23 = vmul.f32 %v1271_v16, %v2465_v38  ;;  %v1292_v8 = vmul.f32 %v1274_v36, %v2465_v38  ;;  %1522 = vst.msk [vmem:[#allocation7 + $0x78] sm:$0xff] %vm1506_vm14, %v1505_v28 }
 0x420   :  { %v1495_v31 = vmul.f32 %v3157_v52, %v1476_v51  ;;  %v1384_v39 = vsub.f32 1.5, %v1383_v20 }
 0x421   :  { %v2180_v50 = vpop.eup %2179  ;;  %1511 = vst.msk [vmem:[#allocation7 + $0x20] sm:$0xff] %vm1506_vm14, %v1494_v14  ;;  %v1394_v61 = vsub.f32 1.5, %v1393_v32  ;;  %v3320_v19 = vadd.f32 1e-05, %v1291_v23  ;;  %v3331_v4 = vadd.f32 1e-05, %v1292_v8 }
 0x422   :  { %1512 = vst.msk [vmem:[#allocation7 + $0x28] sm:$0xff] %vm1506_vm14, %v1495_v31  ;;  %v1411_v40 = vmul.f32 %v2180_v50, %v3271_v60  ;;  %v1385_v41 = vmul.f32 %v2176_v45, %v1384_v39  ;;  %v2182_v29 = vpop.eup %2181  ;;  %vm1417_vm5 = vweird.f32 %v2180_v50  ;;  %v3360_v31 = vld [vmem:[#allocation2 + $0x58] sm:$0xff] }
 0x423   :  { %v1395_v63 = vmul.f32 %v2178_v11, %v1394_v61  ;;  %2183 = vrsqrt.f32 %v3320_v19  ;;  %v1421_v5 = vmul.f32 %v2182_v29, %v3284_v12  ;;  %vm1427_vm7 = vweird.f32 %v2182_v29  ;;  %vm1418_vm10 = vmor %vm1416_vm9, %vm1417_vm5  ;;  %v3354_v12 = vld [vmem:[#allocation2 + $0x50] sm:$0xff] }
 0x424   :  { %v1412_v56 = vmul.f32 %v2180_v50, %v1411_v40  ;;  %v1568_v2 = vpop.permute.xlu0 %1567  ;;  %v1389_v47 = vsel %vm1388_vm4, %v2176_v45, %v1385_v41  ;;  %2185 = vrsqrt.f32 %v3331_v4  ;;  %vm1428_vm11 = vmor %vm1426_vm6, %vm1427_vm7  ;;  %vm1456_vm8 = vweird.f32 %v3331_v4 }
 0x425   :  { %v1478_v44 = vmul.f32 %v3336_v24, %v1389_v47  ;;  %v1399_v43 = vsel %vm3326_vm3, %v2178_v11, %v1395_v63  ;;  %v1422_v54 = vmul.f32 %v2182_v29, %v1421_v5  ;;  %v1621_v0 = vsel %vm61_vm0, %v1568_v2, 0.0  ;;  %v3372_v5 = vld [vmem:[#allocation2 + $0x70] sm:$0xff] }
 0x426   :  { %v1413_v42 = vmul.f32 0.5, %v1412_v56  ;;  %v1558_v1 = vpop.permute.xlu2 %1557  ;;  %v1479_v37 = vmul.f32 %v3341_v48, %v1399_v43  ;;  %1622 = vadd.xlane.f32.xlu0 %v1621_v0  ;;  %vm1446_vm15 = vweird.f32 %v3320_v19  ;;  %vm2039_vm7 = vcmask 1048320  }
 0x427   :  { %v1606_v7 = vsel %vm61_vm0, %v1558_v1, 0.0  ;;  %v1497_v45 = vmul.f32 %v3157_v52, %v1478_v44  ;;  %v1423_v35 = vmul.f32 0.5, %v1422_v54  ;;  %v1612_v54 = vsel %vm61_vm0, %v3296_v30, 0.0 }
 0x428   :  { %v1414_v27 = vsub.f32 1.5, %v1413_v42  ;;  %1607 = vadd.xlane.f32.xlu1 %v1606_v7  ;;  %v1498_v33 = vmul.f32 %v3157_v52, %v1479_v37 }
 0x429   :  { %v2184_v11 = vpop.eup %2183  ;;  %1514 = vst.msk [vmem:[#allocation7 + $0x38] sm:$0xff] %vm1506_vm14, %v1497_v45  ;;  %v1424_v26 = vsub.f32 1.5, %v1423_v35 }
 0x42a   :  { %v1415_v25 = vmul.f32 %v2180_v50, %v1414_v27  ;;  %v2186_v15 = vpop.eup %2185  ;;  %1515 = vst.msk [vmem:[#allocation7 + $0x40] sm:$0xff] %vm1506_vm14, %v1498_v33  ;;  %v1441_v13 = vmul.f32 %v2184_v11, %v3320_v19  ;;  %vm1447_vm13 = vweird.f32 %v2184_v11 }
 0x42b   :  { %v1451_v6 = vmul.f32 %v2186_v15, %v3331_v4  ;;  %v1425_v58 = vmul.f32 %v2182_v29, %v1424_v26  ;;  %vm1457_vm12 = vweird.f32 %v2186_v15  ;;  %vm1448_vm2 = vmor %vm1446_vm15, %vm1447_vm13  ;;  %v3368_v4 = vld [vmem:[#allocation2 + $0x68] sm:$0xff] }
 0x42c   :  { %v1419_v59 = vsel %vm1418_vm10, %v2180_v50, %v1415_v25  ;;  %v1574_v9 = vpop.permute.xlu0 %1573  ;;  %v1442_v51 = vmul.f32 %v2184_v11, %v1441_v13  ;;  %vm1458_vm1 = vmor %vm1456_vm8, %vm1457_vm12 }
 0x42d   :  { %v1481_v10 = vmul.f32 %v3354_v12, %v1419_v59  ;;  %v1630_v60 = vsel %vm61_vm0, %v1574_v9, 0.0  ;;  %v1452_v49 = vmul.f32 %v2186_v15, %v1451_v6  ;;  %v1429_v14 = vsel %vm1428_vm11, %v2182_v29, %v1425_v58 }
 0x42e   :  { %v1564_v16 = vpop.permute.xlu2 %1563  ;;  %v1443_v20 = vmul.f32 0.5, %v1442_v51  ;;  %v1482_v32 = vmul.f32 %v3360_v31, %v1429_v14  ;;  %1631 = vadd.xlane.f32.xlu0 %v1630_v60 }
 0x42f   :  { %v1500_v36 = vmul.f32 %v3157_v52, %v1481_v10  ;;  %v1615_v28 = vsel %vm61_vm0, %v1564_v16, 0.0  ;;  %v1453_v23 = vmul.f32 0.5, %v1452_v49 }
 0x430   :  { %1616 = vadd.xlane.f32.xlu1 %v1615_v28  ;;  %v1444_v8 = vsub.f32 1.5, %v1443_v20  ;;  %v1501_v50 = vmul.f32 %v3157_v52, %v1482_v32 }
 0x431   :  { %1517 = vst.msk [vmem:[#allocation7 + $0x50] sm:$0xff] %vm1506_vm14, %v1500_v36  ;;  %v1454_v39 = vsub.f32 1.5, %v1453_v23 }
 0x432   :  { %v1445_v61 = vmul.f32 %v2184_v11, %v1444_v8  ;;  %1518 = vst.msk [vmem:[#allocation7 + $0x58] sm:$0xff] %vm1506_vm14, %v1501_v50 }
 0x433   :  { %v1455_v40 = vmul.f32 %v2186_v15, %v1454_v39 }
 0x434   :  { %v1580_v41 = vpop.permute.xlu0 %1579  ;;  %v1449_v62 = vsel %vm1448_vm2, %v2184_v11, %v1445_v61 }
 0x435   :  { %v1484_v29 = vmul.f32 %v3368_v4, %v1449_v62  ;;  %v1459_v63 = vsel %vm1458_vm1, %v2186_v15, %v1455_v40  ;;  %v1639_v47 = vsel %vm61_vm0, %v1580_v41, 0.0 }
 0x436   :  { %v1556_v56 = vpop.permute.xlu1 %1555  ;;  %v1570_v2 = vpop.permute.xlu2 %1569  ;;  %v1485_v19 = vmul.f32 %v3372_v5, %v1459_v63  ;;  %1640 = vadd.xlane.f32.xlu0 %v1639_v47 }
 0x437   :  { %v1603_v44 = vsel %vm61_vm0, %v1556_v56, 0.0  ;;  %v1624_v43 = vsel %vm61_vm0, %v1570_v2, 0.0  ;;  %v1503_v42 = vmul.f32 %v3157_v52, %v1484_v29 }
 0x438   :  { %1604 = vadd.xlane.f32.xlu2 %v1603_v44  ;;  %1625 = vadd.xlane.f32.xlu1 %v1624_v43  ;;  %v1504_v1 = vmul.f32 %v3157_v52, %v1485_v19 }
 0x439   :  { %1520 = vst.msk [vmem:[#allocation7 + $0x68] sm:$0xff] %vm1506_vm14, %v1503_v42 }
 0x43a   :  { %1521 = vst.msk [vmem:[#allocation7 + $0x70] sm:$0xff] %vm1506_vm14, %v1504_v1 }
 0x43c   :  { %v1586_v37 = vpop.permute.xlu0 %1585 }
 0x43d   :  { %v1648_v45 = vsel %vm61_vm0, %v1586_v37, 0.0 }
 0x43e   :  { %v1576_v7 = vpop.permute.xlu2 %1575  ;;  %v1566_v0 = vpop.permute.xlu1 %1565  ;;  %1649 = vadd.xlane.f32.xlu0 %v1648_v45 }
 0x43f   :  { %v1633_v27 = vsel %vm61_vm0, %v1576_v7, 0.0  ;;  %v1618_v52 = vsel %vm61_vm0, %v1566_v0, 0.0 }
 0x440   :  { %1613 = vadd.xlane.f32.xlu2 %v1612_v54  ;;  %1634 = vadd.xlane.f32.xlu1 %v1633_v27 }
 0x446   :  { %v1582_v33 = vpop.permute.xlu2 %1581  ;;  %v1572_v35 = vpop.permute.xlu1 %1571 }
 0x447   :  { %v1642_v11 = vsel %vm61_vm0, %v1582_v33, 0.0  ;;  %v1627_v25 = vsel %vm61_vm0, %v1572_v35, 0.0 }
 0x448   :  { %1619 = vadd.xlane.f32.xlu2 %v1618_v52  ;;  %1643 = vadd.xlane.f32.xlu1 %v1642_v11 }
 0x44e   :  { %v1578_v30 = vpop.permute.xlu1 %1577 }
 0x44f   :  { %v1636_v15 = vsel %vm61_vm0, %v1578_v30, 0.0 }
 0x450   :  { %1628 = vadd.xlane.f32.xlu2 %v1627_v25 }
 0x456   :  { %v1584_v26 = vpop.permute.xlu1 %1583 }
 0x457   :  { %v1645_v13 = vsel %vm61_vm0, %v1584_v26, 0.0 }
 0x458   :  { %1637 = vadd.xlane.f32.xlu2 %v1636_v15 }
 0x460   :  { %1646 = vadd.xlane.f32.xlu2 %v1645_v13 }
 0x48a   :  { %v1611_v59 = vpop.xlane.xlu0 %1610 }
 0x48b   :  { %v1653_v6 = vmul.f32 %v1611_v59, %v2465_v38 }
 0x48d   :  { %v1669_v9 = vsub.f32 %v3247_v34, %v1653_v6 }
 0x48f   :  { %v1685_v10 = vmul.f32 %v1669_v9, %v1669_v9 }
 0x491   :  { %1719 = vrot.lane.b32.xlu0 %v1685_v10, %s2342_s23 }
 0x499   :  { %v1623_v50 = vpop.xlane.xlu0 %1622 }
 0x49a   :  { %v1657_v47 = vmul.f32 %v1623_v50, %v2465_v38 }
 0x49b   :  { %v1608_v58 = vpop.xlane.xlu1 %1607 }
 0x49c   :  { %v1652_v51 = vmul.f32 %v1608_v58, %v2465_v38  ;;  %v1673_v42 = vsub.f32 %v3175_v46, %v1657_v47 }
 0x49e   :  { %v1668_v60 = vsub.f32 %v3242_v18, %v1652_v51 }
 0x4a0   :  { %v1684_v49 = vmul.f32 %v1668_v60, %v1668_v60 }
 0x4a1   :  { %v1632_v19 = vpop.xlane.xlu0 %1631 }
 0x4a2   :  { %1717 = vrot.lane.b32.xlu2 %v1684_v49, %s2342_s23  ;;  %v1660_v45 = vmul.f32 %v1632_v19, %v2465_v38 }
 0x4a3   :  { %v1617_v16 = vpop.xlane.xlu1 %1616 }
 0x4a4   :  { %v1655_v36 = vmul.f32 %v1617_v16, %v2465_v38  ;;  %v1676_v46 = vsub.f32 %v3189_v57, %v1660_v45 }
 0x4a6   :  { %v1671_v14 = vsub.f32 %v3298_v3, %v1655_v36  ;;  %v1692_v30 = vmul.f32 %v1676_v46, %v1676_v46 }
 0x4a8   :  { %v1687_v20 = vmul.f32 %v1671_v14, %v1671_v14 }
 0x4a9   :  { %v1641_v35 = vpop.xlane.xlu0 %1640 }
 0x4aa   :  { %1723 = vrot.lane.b32.xlu0 %v1687_v20, %s2342_s23  ;;  %v1663_v26 = vmul.f32 %v1641_v35, %v2465_v38 }
 0x4ab   :  { %v1605_v28 = vpop.xlane.xlu2 %1604  ;;  %v1626_v32 = vpop.xlane.xlu1 %1625 }
 0x4ac   :  { %v1651_v23 = vmul.f32 %v1605_v28, %v2465_v38  ;;  %v1658_v8 = vmul.f32 %v1626_v32, %v2465_v38  ;;  %v1679_v59 = vsub.f32 %v3219_v55, %v1663_v26 }
 0x4ae   :  { %v1667_v39 = vsub.f32 %v3159_v53, %v1651_v23  ;;  %v1674_v61 = vsub.f32 %v3336_v24, %v1658_v8  ;;  %v1695_v10 = vmul.f32 %v1679_v59, %v1679_v59 }
 0x4b0   :  { %v1683_v40 = vmul.f32 %v1667_v39, %v1667_v39  ;;  %v1690_v41 = vmul.f32 %v1674_v61, %v1674_v61 }
 0x4b1   :  { %v1650_v6 = vpop.xlane.xlu0 %1649 }
 0x4b2   :  { %1715 = vrot.lane.b32.xlu1 %v1683_v40, %s2342_s23  ;;  %1729 = vrot.lane.b32.xlu0 %v1690_v41, %s2342_s23  ;;  %v1666_v51 = vmul.f32 %v1650_v6, %v2465_v38 }
 0x4b3   :  { %v1614_v62 = vpop.xlane.xlu2 %1613  ;;  %v1635_v29 = vpop.xlane.xlu1 %1634 }
 0x4b4   :  { %v1654_v63 = vmul.f32 %v1614_v62, %v2465_v38  ;;  %v1661_v56 = vmul.f32 %v1635_v29, %v2465_v38  ;;  %v1682_v49 = vsub.f32 %v3304_v22, %v1666_v51 }
 0x4b6   :  { %v1670_v2 = vsub.f32 %v3165_v21, %v1654_v63  ;;  %v1677_v53 = vsub.f32 %v3354_v12, %v1661_v56  ;;  %v1689_v21 = vmul.f32 %v1673_v42, %v1673_v42  ;;  %v1698_v36 = vmul.f32 %v1682_v49, %v1682_v49 }
 0x4b8   :  { %v1686_v44 = vmul.f32 %v1670_v2, %v1670_v2  ;;  %v1693_v43 = vmul.f32 %v1677_v53, %v1677_v53 }
 0x4ba   :  { %1721 = vrot.lane.b32.xlu1 %v1686_v44, %s2342_s23  ;;  %1735 = vrot.lane.b32.xlu0 %v1693_v43, %s2342_s23 }
 0x4bb   :  { %v1620_v1 = vpop.xlane.xlu2 %1619  ;;  %v1644_v37 = vpop.xlane.xlu1 %1643 }
 0x4bc   :  { %v1656_v54 = vmul.f32 %v1620_v1, %v2465_v38  ;;  %v1664_v7 = vmul.f32 %v1644_v37, %v2465_v38 }
 0x4be   :  { %v1672_v0 = vsub.f32 %v3307_v17, %v1656_v54  ;;  %v1680_v27 = vsub.f32 %v3368_v4, %v1664_v7 }
 0x4c0   :  { %v1688_v52 = vmul.f32 %v1672_v0, %v1672_v0  ;;  %v1696_v33 = vmul.f32 %v1680_v27, %v1680_v27 }
 0x4c2   :  { %1727 = vrot.lane.b32.xlu1 %v1689_v21, %s2342_s23  ;;  %1725 = vrot.lane.b32.xlu2 %v1688_v52, %s2342_s23 }
 0x4c3   :  { %v1629_v11 = vpop.xlane.xlu2 %1628  ;;  %1741 = vrot.lane.b32.xlu0 %v1696_v33, %s2342_s23 }
 0x4c4   :  { %v1659_v25 = vmul.f32 %v1629_v11, %v2465_v38 }
 0x4c6   :  { %v1675_v15 = vsub.f32 %v3341_v48, %v1659_v25 }
 0x4c8   :  { %v1691_v13 = vmul.f32 %v1675_v15, %v1675_v15 }
 0x4ca   :  { %1733 = vrot.lane.b32.xlu1 %v1692_v30, %s2342_s23  ;;  %1731 = vrot.lane.b32.xlu2 %v1691_v13, %s2342_s23 }
 0x4cb   :  { %v1638_v57 = vpop.xlane.xlu2 %1637 }
 0x4cc   :  { %v1662_v9 = vmul.f32 %v1638_v57, %v2465_v38 }
 0x4ce   :  { %v1678_v58 = vsub.f32 %v3360_v31, %v1662_v9 }
 0x4d0   :  { %v1694_v60 = vmul.f32 %v1678_v58, %v1678_v58 }
 0x4d2   :  { %1739 = vrot.lane.b32.xlu1 %v1695_v10, %s2342_s23  ;;  %1737 = vrot.lane.b32.xlu2 %v1694_v60, %s2342_s23 }
 0x4d3   :  { %v1647_v16 = vpop.xlane.xlu2 %1646 }
 0x4d4   :  { %v1665_v55 = vmul.f32 %v1647_v16, %v2465_v38  ;;  %v3456_v16 = vld [vmem:[#allocation5] ss:$0 sm:$0xff] }
 0x4d6   :  { %v1681_v14 = vsub.f32 %v3372_v5, %v1665_v55 }
 0x4d8   :  { %v1697_v20 = vmul.f32 %v1681_v14, %v1681_v14 }
 0x4da   :  { %1745 = vrot.lane.b32.xlu1 %v1698_v36, %s2342_s23  ;;  %1743 = vrot.lane.b32.xlu2 %v1697_v20, %s2342_s23 }
 0x4fc   :  { %v1718_v28 = vpop.permute.xlu2 %1717 }
 0x4fd   :  { %v1766_v32 = vsel %vm61_vm0, %v1718_v28, 0.0 }
 0x503   :  { %1767 = vadd.xlane.f32.xlu2 %v1766_v32  ;;  %v1720_v23 = vpop.permute.xlu0 %1719 }
 0x504   :  { %v1769_v22 = vsel %vm61_vm0, %v1720_v23, 0.0 }
 0x505   :  { %1770 = vadd.xlane.f32.xlu1 %v1769_v22 }
 0x51c   :  { %v1726_v8 = vpop.permute.xlu2 %1725  ;;  %v1724_v50 = vpop.permute.xlu0 %1723 }
 0x51d   :  { %v1778_v39 = vsel %vm61_vm0, %v1726_v8, 0.0  ;;  %v1775_v61 = vsel %vm61_vm0, %v1724_v50, 0.0 }
 0x51e   :  { %1779 = vadd.xlane.f32.xlu1 %v1778_v39  ;;  %1776 = vadd.xlane.f32.xlu2 %v1775_v61 }
 0x524   :  { %v1716_v40 = vpop.permute.xlu1 %1715  ;;  %v1732_v41 = vpop.permute.xlu2 %1731 }
 0x525   :  { %v1763_v62 = vsel %vm61_vm0, %v1716_v40, 0.0  ;;  %v1787_v29 = vsel %vm61_vm0, %v1732_v41, 0.0  ;;  %v1730_v63 = vpop.permute.xlu0 %1729 }
 0x526   :  { %1764 = vadd.xlane.f32.xlu0 %v1763_v62  ;;  %v1784_v56 = vsel %vm61_vm0, %v1730_v63, 0.0  ;;  %1788 = vadd.xlane.f32.xlu1 %v1787_v29 }
 0x527   :  { %1785 = vadd.xlane.f32.xlu2 %v1784_v56 }
 0x52c   :  { %v1722_v2 = vpop.permute.xlu1 %1721  ;;  %v1738_v47 = vpop.permute.xlu2 %1737 }
 0x52d   :  { %v1772_v53 = vsel %vm61_vm0, %v1722_v2, 0.0  ;;  %v1796_v19 = vsel %vm61_vm0, %v1738_v47, 0.0  ;;  %v1736_v44 = vpop.permute.xlu0 %1735 }
 0x52e   :  { %1773 = vadd.xlane.f32.xlu0 %v1772_v53  ;;  %v1793_v43 = vsel %vm61_vm0, %v1736_v44, 0.0  ;;  %1797 = vadd.xlane.f32.xlu1 %v1796_v19 }
 0x52f   :  { %1794 = vadd.xlane.f32.xlu2 %v1793_v43 }
 0x534   :  { %v1728_v42 = vpop.permute.xlu1 %1727  ;;  %v1744_v1 = vpop.permute.xlu2 %1743 }
 0x535   :  { %v1781_v37 = vsel %vm61_vm0, %v1728_v42, 0.0  ;;  %v1805_v54 = vsel %vm61_vm0, %v1744_v1, 0.0  ;;  %v1742_v7 = vpop.permute.xlu0 %1741 }
 0x536   :  { %1782 = vadd.xlane.f32.xlu0 %v1781_v37  ;;  %v1802_v21 = vsel %vm61_vm0, %v1742_v7, 0.0  ;;  %1806 = vadd.xlane.f32.xlu1 %v1805_v54 }
 0x537   :  { %1803 = vadd.xlane.f32.xlu2 %v1802_v21 }
 0x53c   :  { %v1734_v0 = vpop.permute.xlu1 %1733 }
 0x53d   :  { %v1790_v45 = vsel %vm61_vm0, %v1734_v0, 0.0 }
 0x53e   :  { %1791 = vadd.xlane.f32.xlu0 %v1790_v45 }
 0x544   :  { %v1740_v27 = vpop.permute.xlu1 %1739 }
 0x545   :  { %v1799_v52 = vsel %vm61_vm0, %v1740_v27, 0.0 }
 0x546   :  { %1800 = vadd.xlane.f32.xlu0 %v1799_v52 }
 0x54c   :  { %v1746_v33 = vpop.permute.xlu1 %1745 }
 0x54d   :  { %v1808_v35 = vsel %vm61_vm0, %v1746_v33, 0.0 }
 0x54e   :  { %1809 = vadd.xlane.f32.xlu0 %v1808_v35 }
 0x576   :  { %v1768_v46 = vpop.xlane.xlu2 %1767 }
 0x577   :  { %v1812_v11 = vmul.f32 %v1768_v46, %v2465_v38 }
 0x578   :  { %v1771_v30 = vpop.xlane.xlu1 %1770 }
 0x579   :  { %v1828_v25 = vadd.f32 1e-05, %v1812_v11  ;;  %v1813_v15 = vmul.f32 %v1771_v30, %v2465_v38 }
 0x57b   :  { %2187 = vrsqrt.f32 %v1828_v25  ;;  %v1829_v26 = vadd.f32 1e-05, %v1813_v15  ;;  %vm1859_vm14 = vweird.f32 %v1828_v25 }
 0x57d   :  { %2189 = vrsqrt.f32 %v1829_v26  ;;  %vm1869_vm4 = vweird.f32 %v1829_v26 }
 0x581   :  { %v2188_v13 = vpop.eup %2187 }
 0x582   :  { %v1854_v59 = vmul.f32 %v2188_v13, %v1828_v25  ;;  %vm1860_vm3 = vweird.f32 %v2188_v13 }
 0x583   :  { %v2190_v6 = vpop.eup %2189  ;;  %vm1861_vm0 = vmor %vm1859_vm14, %vm1860_vm3 }
 0x584   :  { %v1855_v57 = vmul.f32 %v2188_v13, %v1854_v59  ;;  %v1864_v10 = vmul.f32 %v2190_v6, %v1829_v26  ;;  %vm1870_vm5 = vweird.f32 %v2190_v6 }
 0x585   :  { %vm1871_vm6 = vmor %vm1869_vm4, %vm1870_vm5 }
 0x586   :  { %v1856_v9 = vmul.f32 0.5, %v1855_v57  ;;  %v1865_v51 = vmul.f32 %v2190_v6, %v1864_v10 }
 0x588   :  { %v1857_v58 = vsub.f32 1.5, %v1856_v9  ;;  %v1866_v49 = vmul.f32 0.5, %v1865_v51 }
 0x58a   :  { %v1858_v60 = vmul.f32 %v2188_v13, %v1857_v58  ;;  %v1867_v36 = vsub.f32 1.5, %v1866_v49 }
 0x58c   :  { %v1862_v55 = vsel %vm1861_vm0, %v2188_v13, %v1858_v60  ;;  %v1868_v20 = vmul.f32 %v2190_v6, %v1867_v36 }
 0x58d   :  { %v2005_v14 = vmul.f32 %v3242_v18, %v1862_v55 }
 0x58e   :  { %v1872_v32 = vsel %vm1871_vm6, %v2190_v6, %v1868_v20 }
 0x58f   :  { %v2024_v28 = vmul.f32 %v3456_v16, %v2005_v14  ;;  %v2006_v23 = vmul.f32 %v3247_v34, %v1872_v32 }
 0x591   :  { %2041 = vst.msk [vmem:[#allocation7 + $0x8] sm:$0xff] %vm2039_vm7, %v2024_v28  ;;  %v1780_v22 = vpop.xlane.xlu1 %1779  ;;  %v1777_v8 = vpop.xlane.xlu2 %1776  ;;  %v2025_v61 = vmul.f32 %v3456_v16, %v2006_v23 }
 0x592   :  { %v1816_v50 = vmul.f32 %v1780_v22, %v2465_v38  ;;  %v1815_v39 = vmul.f32 %v1777_v8, %v2465_v38 }
 0x593   :  { %2042 = vst.msk [vmem:[#allocation7 + $0x10] sm:$0xff] %vm2039_vm7, %v2025_v61 }
 0x594   :  { %v1832_v40 = vadd.f32 1e-05, %v1816_v50  ;;  %v1831_v18 = vadd.f32 1e-05, %v1815_v39 }
 0x596   :  { %2191 = vrsqrt.f32 %v1832_v40  ;;  %vm1899_vm9 = vweird.f32 %v1832_v40  ;;  %vm1889_vm11 = vweird.f32 %v1831_v18 }
 0x597   :  { %2193 = vrsqrt.f32 %v1831_v18 }
 0x599   :  { %v1765_v41 = vpop.xlane.xlu0 %1764  ;;  %v1789_v62 = vpop.xlane.xlu1 %1788 }
 0x59a   :  { %v1811_v29 = vmul.f32 %v1765_v41, %v2465_v38  ;;  %v1819_v34 = vmul.f32 %v1789_v62, %v2465_v38  ;;  %v1786_v63 = vpop.xlane.xlu2 %1785 }
 0x59b   :  { %v1818_v56 = vmul.f32 %v1786_v63, %v2465_v38 }
 0x59c   :  { %v2192_v2 = vpop.eup %2191  ;;  %v3469_v47 = vadd.f32 1e-05, %v1811_v29  ;;  %v3471_v53 = vadd.f32 1e-05, %v1819_v34 }
 0x59d   :  { %v2194_v19 = vpop.eup %2193  ;;  %v1894_v44 = vmul.f32 %v2192_v2, %v1832_v40  ;;  %v3473_v43 = vadd.f32 1e-05, %v1818_v56  ;;  %vm1900_vm10 = vweird.f32 %v2192_v2 }
 0x59e   :  { %2195 = vrsqrt.f32 %v3469_v47  ;;  %v1884_v42 = vmul.f32 %v2194_v19, %v1831_v18  ;;  %vm1890_vm8 = vweird.f32 %v2194_v19  ;;  %vm1849_vm12 = vweird.f32 %v3469_v47  ;;  %vm3484_vm13 = vmor %vm1899_vm9, %vm1900_vm10 }
 0x59f   :  { %v1895_v1 = vmul.f32 %v2192_v2, %v1894_v44  ;;  %2197 = vrsqrt.f32 %v3471_v53  ;;  %vm1929_vm15 = vweird.f32 %v3471_v53  ;;  %vm3497_vm1 = vmor %vm1889_vm11, %vm1890_vm8  ;;  %vm1919_vm2 = vweird.f32 %v3473_v43 }
 0x5a0   :  { %v1885_v37 = vmul.f32 %v2194_v19, %v1884_v42  ;;  %2199 = vrsqrt.f32 %v3473_v43 }
 0x5a1   :  { %v1896_v54 = vmul.f32 0.5, %v1895_v1  ;;  %v1774_v7 = vpop.xlane.xlu0 %1773  ;;  %v1798_v21 = vpop.xlane.xlu1 %1797 }
 0x5a2   :  { %v1886_v0 = vmul.f32 0.5, %v1885_v37  ;;  %v1814_v45 = vmul.f32 %v1774_v7, %v2465_v38  ;;  %v1822_v27 = vmul.f32 %v1798_v21, %v2465_v38  ;;  %v1795_v52 = vpop.xlane.xlu2 %1794 }
 0x5a3   :  { %v1897_v33 = vsub.f32 1.5, %v1896_v54  ;;  %v1821_v35 = vmul.f32 %v1795_v52, %v2465_v38 }
 0x5a4   :  { %v3481_v46 = vpop.eup %2195  ;;  %v1887_v25 = vsub.f32 1.5, %v1886_v0  ;;  %v3488_v30 = vadd.f32 1e-05, %v1814_v45  ;;  %v3502_v57 = vadd.f32 1e-05, %v1822_v27 }
 0x5a5   :  { %v3491_v15 = vpop.eup %2197  ;;  %v1844_v26 = vmul.f32 %v3481_v46, %v3469_v47  ;;  %v1898_v13 = vmul.f32 %v2192_v2, %v1897_v33  ;;  %vm1850_vm14 = vweird.f32 %v3481_v46  ;;  %v3512_v49 = vadd.f32 1e-05, %v1821_v35 }
 0x5a6   :  { %v2200_v6 = vpop.eup %2199  ;;  %v1888_v9 = vmul.f32 %v2194_v19, %v1887_v25  ;;  %2201 = vrsqrt.f32 %v3488_v30  ;;  %v1924_v10 = vmul.f32 %v3491_v15, %v3471_v53  ;;  %vm1930_vm3 = vweird.f32 %v3491_v15  ;;  %vm3531_vm4 = vmor %vm1849_vm12, %vm1850_vm14 }
 0x5a7   :  { %v1845_v58 = vmul.f32 %v3481_v46, %v1844_v26  ;;  %v1902_v51 = vsel %vm3484_vm13, %v2192_v2, %v1898_v13  ;;  %v1914_v60 = vmul.f32 %v2200_v6, %v3473_v43  ;;  %2203 = vrsqrt.f32 %v3502_v57  ;;  %vm3547_vm5 = vmor %vm1929_vm15, %vm1930_vm3  ;;  %v2251_v43 = vld [vmem:[#allocation2] sm:$0xff] }
 0x5a8   :  { %v2009_v55 = vmul.f32 %v3307_v17, %v1902_v51  ;;  %v1892_v36 = vsel %vm3497_vm1, %v2194_v19, %v1888_v9  ;;  %v1925_v14 = vmul.f32 %v3491_v15, %v1924_v10  ;;  %vm1920_vm0 = vweird.f32 %v2200_v6 }
 0x5a9   :  { %v1846_v20 = vmul.f32 0.5, %v1845_v58  ;;  %v2008_v28 = vmul.f32 %v3298_v3, %v1892_v36  ;;  %v1915_v32 = vmul.f32 %v2200_v6, %v1914_v60  ;;  %v1783_v23 = vpop.xlane.xlu0 %1782  ;;  %v1807_v22 = vpop.xlane.xlu1 %1806  ;;  %2205 = vrsqrt.f32 %v3512_v49  ;;  %vm3556_vm9 = vmor %vm1919_vm2, %vm1920_vm0 }
 0x5aa   :  { %v2028_v8 = vmul.f32 %v3456_v16, %v2009_v55  ;;  %v1926_v50 = vmul.f32 0.5, %v1925_v14  ;;  %v1817_v17 = vmul.f32 %v1783_v23, %v2465_v38  ;;  %v1825_v29 = vmul.f32 %v1807_v22, %v2465_v38  ;;  %v1804_v47 = vpop.xlane.xlu2 %1803 }
 0x5ab   :  { %v1847_v39 = vsub.f32 1.5, %v1846_v20  ;;  %v2027_v61 = vmul.f32 %v3456_v16, %v2008_v28  ;;  %v1916_v40 = vmul.f32 0.5, %v1915_v32  ;;  %vm1879_vm6 = vweird.f32 %v3488_v30 }
 0x5ac   :  { %v3525_v18 = vpop.eup %2201  ;;  %2045 = vst.msk [vmem:[#allocation7 + $0x28] sm:$0xff] %vm2039_vm7, %v2028_v8  ;;  %v1927_v41 = vsub.f32 1.5, %v1926_v50  ;;  %v3536_v62 = vadd.f32 1e-05, %v1817_v17  ;;  %v3561_v53 = vadd.f32 1e-05, %v1825_v29  ;;  %vm1959_vm10 = vweird.f32 %v3502_v57 }
 0x5ad   :  { %v1848_v34 = vmul.f32 %v3481_v46, %v1847_v39  ;;  %2044 = vst.msk [vmem:[#allocation7 + $0x20] sm:$0xff] %vm2039_vm7, %v2027_v61  ;;  %v1874_v63 = vmul.f32 %v3525_v18, %v3488_v30  ;;  %v1917_v2 = vsub.f32 1.5, %v1916_v40  ;;  %v3563_v42 = vpop.eup %2203  ;;  %v1824_v45 = vmul.f32 %v1804_v47, %v2465_v38  ;;  %v2252_v30 = vld [vmem:[#allocation2 + $0x18] sm:$0xff] }
 0x5ae   :  { %v1928_v19 = vmul.f32 %v3491_v15, %v1927_v41  ;;  %2207 = vrsqrt.f32 %v3536_v62  ;;  %v1954_v0 = vmul.f32 %v3563_v42, %v3502_v57  ;;  %vm1880_vm11 = vweird.f32 %v3525_v18 }
 0x5af   :  { %v1852_v1 = vsel %vm3531_vm4, %v3481_v46, %v1848_v34  ;;  %v1875_v37 = vmul.f32 %v3525_v18, %v1874_v63  ;;  %v1918_v54 = vmul.f32 %v2200_v6, %v1917_v2  ;;  %v3576_v27 = vpop.eup %2205  ;;  %2209 = vrsqrt.f32 %v3561_v53  ;;  %vm1881_vm13 = vmor %vm1879_vm6, %vm1880_vm11 }
 0x5b0   :  { %v2004_v7 = vmul.f32 %v2251_v43, %v1852_v1  ;;  %v1932_v21 = vsel %vm3547_vm5, %v3491_v15, %v1928_v19  ;;  %v1955_v15 = vmul.f32 %v3563_v42, %v1954_v0  ;;  %v1944_v26 = vmul.f32 %v3576_v27, %v3512_v49  ;;  %v2253_v43 = vld [vmem:[#allocation2 + $0x30] sm:$0xff] }
 0x5b1   :  { %v1876_v52 = vmul.f32 0.5, %v1875_v37  ;;  %v2012_v33 = vmul.f32 %v3341_v48, %v1932_v21  ;;  %v1922_v35 = vsel %vm3556_vm9, %v2200_v6, %v1918_v54  ;;  %v1792_v46 = vpop.xlane.xlu0 %1791  ;;  %vm1960_vm8 = vweird.f32 %v3563_v42 }
 0x5b2   :  { %v2023_v11 = vmul.f32 %v3456_v16, %v2004_v7  ;;  %v2011_v25 = vmul.f32 %v3336_v24, %v1922_v35  ;;  %v1820_v59 = vmul.f32 %v1792_v46, %v2465_v38  ;;  %v1956_v10 = vmul.f32 0.5, %v1955_v15  ;;  %vm3611_vm1 = vmor %vm1959_vm10, %vm1960_vm8 }
 0x5b3   :  { %v1877_v13 = vsub.f32 1.5, %v1876_v52  ;;  %v2031_v48 = vmul.f32 %v3456_v16, %v2012_v33  ;;  %v1945_v24 = vmul.f32 %v3576_v27, %v1944_v26  ;;  %vm1949_vm12 = vweird.f32 %v3512_v49 }
 0x5b4   :  { %v2208_v6 = vpop.eup %2207  ;;  %2040 = vst.msk [vmem:[#allocation7] sm:$0xff] %vm2039_vm7, %v2023_v11  ;;  %v2030_v9 = vmul.f32 %v3456_v16, %v2011_v25  ;;  %v3598_v60 = vadd.f32 1e-05, %v1820_v59  ;;  %v1957_v55 = vsub.f32 1.5, %v1956_v10  ;;  %vm1950_vm15 = vweird.f32 %v3576_v27  ;;  %v2254_v10 = vld [vmem:[#allocation2 + $0x48] sm:$0xff] }
 0x5b5   :  { %v1878_v58 = vmul.f32 %v3525_v18, %v1877_v13  ;;  %2048 = vst.msk [vmem:[#allocation7 + $0x40] sm:$0xff] %vm2039_vm7, %v2031_v48  ;;  %v1904_v51 = vmul.f32 %v2208_v6, %v3536_v62  ;;  %v1946_v36 = vmul.f32 0.5, %v1945_v24  ;;  %v3604_v14 = vadd.f32 1e-05, %v1824_v45  ;;  %v2210_v20 = vpop.eup %2209  ;;  %vm3621_vm14 = vmor %vm1949_vm12, %vm1950_vm15 }
 0x5b6   :  { %2047 = vst.msk [vmem:[#allocation7 + $0x38] sm:$0xff] %vm2039_vm7, %v2030_v9  ;;  %2211 = vrsqrt.f32 %v3598_v60  ;;  %v1958_v8 = vmul.f32 %v3563_v42, %v1957_v55  ;;  %v1984_v17 = vmul.f32 %v2210_v20, %v3561_v53  ;;  %vm1909_vm2 = vweird.f32 %v3536_v62 }
 0x5b7   :  { %v1882_v28 = vsel %vm1881_vm13, %v3525_v18, %v1878_v58  ;;  %v1905_v32 = vmul.f32 %v2208_v6, %v1904_v51  ;;  %v1947_v50 = vsub.f32 1.5, %v1946_v36  ;;  %2213 = vrsqrt.f32 %v3604_v14 }
 0x5b8   :  { %v2007_v22 = vmul.f32 %v2252_v30, %v1882_v28  ;;  %v1962_v18 = vsel %vm3611_vm1, %v3563_v42, %v1958_v8  ;;  %v1985_v41 = vmul.f32 %v2210_v20, %v1984_v17  ;;  %vm1910_vm3 = vweird.f32 %v2208_v6 }
 0x5b9   :  { %v1906_v39 = vmul.f32 0.5, %v1905_v32  ;;  %v1801_v61 = vpop.xlane.xlu0 %1800  ;;  %v1948_v3 = vmul.f32 %v3576_v27, %v1947_v50  ;;  %v2015_v49 = vmul.f32 %v3360_v31, %v1962_v18  ;;  %vm1989_vm0 = vweird.f32 %v3561_v53  ;;  %vm1911_vm5 = vmor %vm1909_vm2, %vm1910_vm3 }
 0x5ba   :  { %v2026_v40 = vmul.f32 %v3456_v16, %v2007_v22  ;;  %v1823_v34 = vmul.f32 %v1801_v61, %v2465_v38  ;;  %v1986_v56 = vmul.f32 0.5, %v1985_v41  ;;  %vm1990_vm4 = vweird.f32 %v2210_v20  ;;  %v2255_v22 = vld [vmem:[#allocation2 + $0x60] sm:$0xff]  ;;  %v2256_v61 = vld [vmem:[#allocation2 + $0x78] sm:$0xff] }
 0x5bb   :  { %v1907_v29 = vsub.f32 1.5, %v1906_v39  ;;  %v1952_v63 = vsel %vm3621_vm14, %v3576_v27, %v1948_v3  ;;  %v2034_v19 = vmul.f32 %v3456_v16, %v2015_v49  ;;  %vm1991_vm6 = vmor %vm1989_vm0, %vm1990_vm4  ;;  %vm1979_vm10 = vweird.f32 %v3604_v14 }
 0x5bc   :  { %2043 = vst.msk [vmem:[#allocation7 + $0x18] sm:$0xff] %vm2039_vm7, %v2026_v40  ;;  %v2212_v2 = vpop.eup %2211  ;;  %v2014_v44 = vmul.f32 %v3354_v12, %v1952_v63  ;;  %v1839_v42 = vadd.f32 1e-05, %v1823_v34  ;;  %v1987_v1 = vsub.f32 1.5, %v1986_v56  ;;  %vm1939_vm8 = vweird.f32 %v3598_v60 }
 0x5bd   :  { %v1908_v47 = vmul.f32 %v2208_v6, %v1907_v29  ;;  %v1934_v31 = vmul.f32 %v2212_v2, %v3598_v60  ;;  %v2214_v37 = vpop.eup %2213  ;;  %2051 = vst.msk [vmem:[#allocation7 + $0x58] sm:$0xff] %vm2039_vm7, %v2034_v19  ;;  %vm1940_vm9 = vweird.f32 %v2212_v2 }
 0x5be   :  { %v2033_v53 = vmul.f32 %v3456_v16, %v2014_v44  ;;  %2215 = vrsqrt.f32 %v1839_v42  ;;  %v1988_v0 = vmul.f32 %v2210_v20, %v1987_v1  ;;  %v1974_v12 = vmul.f32 %v2214_v37, %v3604_v14  ;;  %vm1941_vm12 = vmor %vm1939_vm8, %vm1940_vm9 }
 0x5bf   :  { %v1912_v54 = vsel %vm1911_vm5, %v2208_v6, %v1908_v47  ;;  %v1935_v21 = vmul.f32 %v2212_v2, %v1934_v31  ;;  %vm1980_vm11 = vweird.f32 %v2214_v37  ;;  %vm1969_vm1 = vweird.f32 %v1839_v42 }
 0x5c0   :  { %v2010_v7 = vmul.f32 %v2253_v43, %v1912_v54  ;;  %2050 = vst.msk [vmem:[#allocation7 + $0x50] sm:$0xff] %vm2039_vm7, %v2033_v53  ;;  %v1992_v52 = vsel %vm1991_vm6, %v2210_v20, %v1988_v0  ;;  %v1975_v33 = vmul.f32 %v2214_v37, %v1974_v12  ;;  %vm1981_vm13 = vmor %vm1979_vm10, %vm1980_vm11 }
 0x5c1   :  { %v1810_v62 = vpop.xlane.xlu0 %1809  ;;  %v1936_v27 = vmul.f32 0.5, %v1935_v21  ;;  %v2018_v35 = vmul.f32 %v3372_v5, %v1992_v52 }
 0x5c2   :  { %v2029_v45 = vmul.f32 %v3456_v16, %v2010_v7  ;;  %v1826_v46 = vmul.f32 %v1810_v62, %v2465_v38  ;;  %v1976_v25 = vmul.f32 0.5, %v1975_v33 }
 0x5c3   :  { %v1937_v11 = vsub.f32 1.5, %v1936_v27  ;;  %v2037_v26 = vmul.f32 %v3456_v16, %v2018_v35 }
 0x5c4   :  { %2046 = vst.msk [vmem:[#allocation7 + $0x30] sm:$0xff] %vm2039_vm7, %v2029_v45  ;;  %v2216_v15 = vpop.eup %2215  ;;  %v1842_v13 = vadd.f32 1e-05, %v1826_v46  ;;  %v1977_v59 = vsub.f32 1.5, %v1976_v25 }
 0x5c5   :  { %v1938_v48 = vmul.f32 %v2212_v2, %v1937_v11  ;;  %v1964_v6 = vmul.f32 %v2216_v15, %v1839_v42  ;;  %2054 = vst.msk [vmem:[#allocation7 + $0x70] sm:$0xff] %vm2039_vm7, %v2037_v26  ;;  %vm1970_vm15 = vweird.f32 %v2216_v15 }
 0x5c6   :  { %2217 = vrsqrt.f32 %v1842_v13  ;;  %v1978_v5 = vmul.f32 %v2214_v37, %v1977_v59  ;;  %vm1971_vm2 = vmor %vm1969_vm1, %vm1970_vm15  ;;  %vm1999_vm3 = vweird.f32 %v1842_v13 }
 0x5c7   :  { %v1942_v38 = vsel %vm1941_vm12, %v2212_v2, %v1938_v48  ;;  %v1965_v9 = vmul.f32 %v2216_v15, %v1964_v6 }
 0x5c8   :  { %v2013_v24 = vmul.f32 %v2254_v10, %v1942_v38  ;;  %v1982_v58 = vsel %vm1981_vm13, %v2214_v37, %v1978_v5 }
 0x5c9   :  { %v1966_v51 = vmul.f32 0.5, %v1965_v9  ;;  %v2017_v55 = vmul.f32 %v3368_v4, %v1982_v58 }
 0x5ca   :  { %v2032_v60 = vmul.f32 %v3456_v16, %v2013_v24 }
 0x5cb   :  { %v1967_v36 = vsub.f32 1.5, %v1966_v51  ;;  %v2036_v20 = vmul.f32 %v3456_v16, %v2017_v55 }
 0x5cc   :  { %v2218_v14 = vpop.eup %2217  ;;  %2049 = vst.msk [vmem:[#allocation7 + $0x48] sm:$0xff] %vm2039_vm7, %v2032_v60 }
 0x5cd   :  { %v1968_v28 = vmul.f32 %v2216_v15, %v1967_v36  ;;  %v1994_v32 = vmul.f32 %v2218_v14, %v1842_v13  ;;  %2053 = vst.msk [vmem:[#allocation7 + $0x68] sm:$0xff] %vm2039_vm7, %v2036_v20  ;;  %vm2000_vm14 = vweird.f32 %v2218_v14 }
 0x5ce   :  { %vm2001_vm0 = vmor %vm1999_vm3, %vm2000_vm14 }
 0x5cf   :  { %v1972_v23 = vsel %vm1971_vm2, %v2216_v15, %v1968_v28  ;;  %v1995_v30 = vmul.f32 %v2218_v14, %v1994_v32 }
 0x5d0   :  { %v2016_v8 = vmul.f32 %v2255_v22, %v1972_v23 }
 0x5d1   :  { %v1996_v50 = vmul.f32 0.5, %v1995_v30 }
 0x5d2   :  { %v2035_v4 = vmul.f32 %v3456_v16, %v2016_v8 }
 0x5d3   :  { %v1997_v17 = vsub.f32 1.5, %v1996_v50 }
 0x5d4   :  { %2052 = vst.msk [vmem:[#allocation7 + $0x60] sm:$0xff] %vm2039_vm7, %v2035_v4 }
 0x5d5   :  { %v1998_v39 = vmul.f32 %v2218_v14, %v1997_v17 }
 0x5d7   :  { %v2002_v57 = vsel %vm2001_vm0, %v2218_v14, %v1998_v39 }
 0x5d8   :  { %v2019_v40 = vmul.f32 %v2256_v61, %v2002_v57 }
 0x5da   :  { %v2038_v18 = vmul.f32 %v3456_v16, %v2019_v40 }
 0x5dc   :  { %2055 = vst.msk [vmem:[#allocation7 + $0x78] sm:$0xff] %vm2039_vm7, %v2038_v18 }
 0x5dd   :  { %2068 = dma.vmem_to_hbm [thread:$0]  %s2061_s25, 2048, %s2063_s28, [#allocation4], %s2336_s20, %s2336_s20, %s2337_s2  }
 0x5de   :  { %2333 = dma.done.wait [#allocation4], 2048  }
 0x5df   :  { %2334 = vsyncadd [#allocation4], 4294965248 }
 0x5e0   :  { %2073 = vsyncpa [#allocation3], 1 }
 0x5e1   :  { %2074 = vsyncpa [#allocation6], 1 }
 0x5e2   :  { %2075 = vsyncpa [#allocation4], 1 }

</bundles_post_ra>
